<compile_context>
chip_gen: v6e
topology: v6e:2x2x1
jax: 0.10.0
libtpu: 0.0.40
codegen_flags: <defaults>
</compile_context>

<pallas_src>
import functools

import jax
import jax.numpy as jnp
from jax.experimental import pallas as pl
from jax.experimental.pallas import tpu as pltpu


CFG = dict(
    vocab_size=100,
    hidden=32,
    num_layers=2,
    num_heads=4,
    intermediate=64,
    max_position=16,
    type_vocab=2,
)

LANE = 128  # TPU lane width; regressor output padded to this for lane-dense stores.


def _gelu_tanh(x):
    # TODO(synk): HF BERT uses exact erf-GELU; tanh approximation kept for robust
    #             Mosaic lowering (EUP tanh).
    return 0.5 * x * (1.0 + jnp.tanh(0.7978845608028654 * (x + 0.044715 * x * x * x)))


# ----------------------------------------------------------------------------
# Fused encoder kernel: one grid step == one encoder layer.
# ----------------------------------------------------------------------------
def _encoder_kernel(
    emb_ref, mask_ref, eg_ref, eb_ref,
    wqkv_ref, bqkv_ref, wo_ref, bo_ref,
    ln1g_ref, ln1b_ref, w1_ref, b1_ref, w2_ref, b2_ref, ln2g_ref, ln2b_ref,
    poolw_ref, poolb_ref, regw_ref, regb_ref,
    out_ref,
    h_ref,
    *, B, S, H, nH, eps,
):
    layer = pl.program_id(0)
    last = pl.num_programs(0) - 1
    Dh = H // nH
    scale = 1.0 / float(Dh) ** 0.5

    def layer_norm(x, g, b):
        mean = jnp.mean(x, axis=-1, keepdims=True)
        ctr = x - mean
        var = jnp.mean(ctr * ctr, axis=-1, keepdims=True)
        return ctr * jax.lax.rsqrt(var + eps) * g + b

    def mm(x_f32, w_bf16):  # bf16 MXU matmul, f32 accumulation
        return jnp.dot(x_f32.astype(jnp.bfloat16), w_bf16,
                       preferred_element_type=jnp.float32)

    # ---- layer 0: embedding LayerNorm -> VMEM-resident hidden state --------
    @pl.when(layer == 0)
    def _():
        h_ref[...] = layer_norm(emb_ref[...], eg_ref[...], eb_ref[...])
        out_ref[...] = jnp.zeros_like(out_ref)

    h = h_ref[...]                                                   # (B*S, H) f32

    # ---- fused QKV projection (one (H, 3H) matmul) ---------------------------
    qkv = mm(h, wqkv_ref[0]) + bqkv_ref[0]                           # (B*S, 3H)
    q = qkv[:, 0:H]
    k = qkv[:, H:2 * H]
    v = qkv[:, 2 * H:3 * H]

    # additive mask bias computed in-kernel from the raw (B, S) attention mask
    bias = (1.0 - mask_ref[...]) * -10000.0                          # (B, S)

    # ---- attention: static unrolled loops over (batch, head) ---------------
    ctx_batches = []
    for b in range(B):
        qb = q[b * S:(b + 1) * S, :]
        kb = k[b * S:(b + 1) * S, :]
        vb = v[b * S:(b + 1) * S, :]
        bias_b = bias[b:b + 1, :]                                    # (1, S)
        heads = []
        for hh in range(nH):
            qh = qb[:, hh * Dh:(hh + 1) * Dh]                        # (S, Dh)
            kh = kb[:, hh * Dh:(hh + 1) * Dh]
            vh = vb[:, hh * Dh:(hh + 1) * Dh]
            s = jax.lax.dot_general(qh, kh, (((1,), (1,)), ((), ())),
                                    preferred_element_type=jnp.float32)
            s = s * scale + bias_b
            s = s - jnp.max(s, axis=-1, keepdims=True)
            p = jnp.exp(s)
            p = p * pl.reciprocal(jnp.sum(p, axis=-1, keepdims=True), approx=True)
            heads.append(jnp.dot(p, vh, preferred_element_type=jnp.float32))
        ctx_batches.append(jnp.concatenate(heads, axis=-1))          # (S, H)
    ctx = jnp.concatenate(ctx_batches, axis=0)                       # (B*S, H)

    # ---- output projection + residual + LN1 (fused) -------------------------
    attn_out = mm(ctx, wo_ref[0]) + bo_ref[0]
    x1 = layer_norm(h + attn_out, ln1g_ref[0], ln1b_ref[0])

    # ---- FFN (GELU) + residual + LN2 (fused) --------------------------------
    ff = _gelu_tanh(mm(x1, w1_ref[0]) + b1_ref[0])
    ff = mm(ff, w2_ref[0]) + b2_ref[0]
    h_new = layer_norm(x1 + ff, ln2g_ref[0], ln2b_ref[0])
    h_ref[...] = h_new

    # ---- last layer: fused pooler (dense+tanh) + regressor head -------------
    # Computed for all B*S rows (trivially cheap) so the output slab is a single
    # lane-dense (B*S, 128) store; the wrapper slices out [CLS] rows / lane 0.
    @pl.when(layer == last)
    def _():
        pooled = jnp.tanh(mm(h_new, poolw_ref[...]) + poolb_ref[...])    # (B*S, H)
        out_ref[...] = (jnp.dot(pooled, regw_ref[...],
                                preferred_element_type=jnp.float32)
                        + regb_ref[...])                                  # (B*S, 128)


# ----------------------------------------------------------------------------
# Parameter init (deterministic, weights stacked per-layer, stored bf16)
# ----------------------------------------------------------------------------
def init_params(key, cfg):
    H = cfg["hidden"]
    I = cfg["intermediate"]
    L = cfg["num_layers"]
    wdt = jnp.bfloat16

    def nrm(k, shape):
        return jax.random.normal(k, shape, dtype=jnp.float32) * 0.02

    ks = iter(jax.random.split(key, 16))

    reg_w = nrm(next(ks), (H, 1))
    reg_w_pad = jnp.zeros((H, LANE), jnp.float32).at[:, 0:1].set(reg_w)
    reg_b_pad = jnp.zeros((1, LANE), jnp.float32)

    return dict(
        word_emb=nrm(next(ks), (cfg["vocab_size"], H)),
        pos_emb=nrm(next(ks), (cfg["max_position"], H)),
        type_emb=nrm(next(ks), (cfg["type_vocab"], H)),
        emb_ln_g=jnp.ones((1, H), jnp.float32),
        emb_ln_b=jnp.zeros((1, H), jnp.float32),
        w_qkv=nrm(next(ks), (L, H, 3 * H)).astype(wdt),
        b_qkv=jnp.zeros((L, 1, 3 * H), jnp.float32),
        w_o=nrm(next(ks), (L, H, H)).astype(wdt),
        b_o=jnp.zeros((L, 1, H), jnp.float32),
        ln1_g=jnp.ones((L, 1, H), jnp.float32),
        ln1_b=jnp.zeros((L, 1, H), jnp.float32),
        w1=nrm(next(ks), (L, H, I)).astype(wdt),
        b1=jnp.zeros((L, 1, I), jnp.float32),
        w2=nrm(next(ks), (L, I, H)).astype(wdt),
        b2=jnp.zeros((L, 1, H), jnp.float32),
        ln2_g=jnp.ones((L, 1, H), jnp.float32),
        ln2_b=jnp.zeros((L, 1, H), jnp.float32),
        pool_w=nrm(next(ks), (H, H)).astype(wdt),
        pool_b=jnp.zeros((1, H), jnp.float32),
        reg_w=reg_w_pad,
        reg_b=reg_b_pad,
    )


# ----------------------------------------------------------------------------
# Forward pass: embeddings (glue) -> one fused Pallas encoder+head kernel
# ----------------------------------------------------------------------------
def bert_regressor_forward(params, input_ids, attention_mask):
    cfg = CFG
    B, S = input_ids.shape
    H, nH, L = cfg["hidden"], cfg["num_heads"], cfg["num_layers"]
    BS = B * S

    # Embedding gathers stay in plain JAX (glue); sum of word + pos + type(0).
    tok = jnp.take(params["word_emb"], input_ids, axis=0)            # (B, S, H)
    pos = params["pos_emb"][:S][None, :, :]                          # (1, S, H)
    typ = params["type_emb"][0][None, None, :]                       # token_type_ids=None
    emb = (tok + pos + typ).reshape(BS, H)
    mask = attention_mask.astype(jnp.float32)                        # (B, S)

    kernel = functools.partial(_encoder_kernel, B=B, S=S, H=H, nH=nH, eps=1e-12)

    def full2d(a):
        return pl.BlockSpec(a.shape, lambda l: (0, 0))

    def per_layer(a):
        return pl.BlockSpec((1,) + a.shape[1:], lambda l: (l, 0, 0))

    in_specs = [
        full2d(emb), full2d(mask),
        full2d(params["emb_ln_g"]), full2d(params["emb_ln_b"]),
        per_layer(params["w_qkv"]), per_layer(params["b_qkv"]),
        per_layer(params["w_o"]), per_layer(params["b_o"]),
        per_layer(params["ln1_g"]), per_layer(params["ln1_b"]),
        per_layer(params["w1"]), per_layer(params["b1"]),
        per_layer(params["w2"]), per_layer(params["b2"]),
        per_layer(params["ln2_g"]), per_layer(params["ln2_b"]),
        full2d(params["pool_w"]), full2d(params["pool_b"]),
        full2d(params["reg_w"]), full2d(params["reg_b"]),
    ]

    out_slab = pl.pallas_call(
        kernel,
        out_shape=jax.ShapeDtypeStruct((BS, LANE), jnp.float32),
        grid=(L,),
        in_specs=in_specs,
        out_specs=pl.BlockSpec((BS, LANE), lambda l: (0, 0)),
        scratch_shapes=[pltpu.VMEM((BS, H), jnp.float32)],
        compiler_params=pltpu.CompilerParams(
            dimension_semantics=("arbitrary",)),   # layers are sequential
    )(emb, mask, params["emb_ln_g"], params["emb_ln_b"],
      params["w_qkv"], params["b_qkv"], params["w_o"], params["b_o"],
      params["ln1_g"], params["ln1_b"], params["w1"], params["b1"],
      params["w2"], params["b2"], params["ln2_g"], params["ln2_b"],
      params["pool_w"], params["pool_b"], params["reg_w"], params["reg_b"])

    # [CLS] row of each batch; regressor scalar is lane 0 of the padded slab.
    return out_slab.reshape(B, S, LANE)[:, 0, 0:1]


# ----------------------------------------------------------------------------
if __name__ == "__main__":
    key = jax.random.PRNGKey(0)
    k_param, k_ids = jax.random.split(key)

    params = init_params(k_param, CFG)

    B, S = 2, 8
    input_ids = jax.random.randint(k_ids, (B, S), 0, CFG["vocab_size"], dtype=jnp.int32)
    attention_mask = jnp.ones((B, S), dtype=jnp.int32)

    fwd = jax.jit(bert_regressor_forward)
    out = fwd(params, input_ids, attention_mask)
    out = jax.block_until_ready(out)
    assert out.shape == (B, 1)
    print("KERNEL_OK")
</pallas_src>

<mosaic_0001>
module attributes {stable_mosaic.version = 11 : i64} {
  func.func @_encoder_kernel(%arg0: i32, %arg1: memref<16x32xf32, #tpu.memory_space<vmem>>, %arg2: memref<2x8xf32, #tpu.memory_space<vmem>>, %arg3: memref<1x32xf32, #tpu.memory_space<vmem>>, %arg4: memref<1x32xf32, #tpu.memory_space<vmem>>, %arg5: memref<1x32x96xbf16, #tpu.memory_space<vmem>>, %arg6: memref<1x1x96xf32, #tpu.memory_space<vmem>>, %arg7: memref<1x32x32xbf16, #tpu.memory_space<vmem>>, %arg8: memref<1x1x32xf32, #tpu.memory_space<vmem>>, %arg9: memref<1x1x32xf32, #tpu.memory_space<vmem>>, %arg10: memref<1x1x32xf32, #tpu.memory_space<vmem>>, %arg11: memref<1x32x64xbf16, #tpu.memory_space<vmem>>, %arg12: memref<1x1x64xf32, #tpu.memory_space<vmem>>, %arg13: memref<1x64x32xbf16, #tpu.memory_space<vmem>>, %arg14: memref<1x1x32xf32, #tpu.memory_space<vmem>>, %arg15: memref<1x1x32xf32, #tpu.memory_space<vmem>>, %arg16: memref<1x1x32xf32, #tpu.memory_space<vmem>>, %arg17: memref<32x32xbf16, #tpu.memory_space<vmem>>, %arg18: memref<1x32xf32, #tpu.memory_space<vmem>>, %arg19: memref<32x128xf32, #tpu.memory_space<vmem>>, %arg20: memref<1x128xf32, #tpu.memory_space<vmem>>, %arg21: memref<16x128xf32, #tpu.memory_space<vmem>>, %arg22: memref<16x32xf32, #tpu.memory_space<vmem>>) attributes {dimension_semantics = [#tpu.dimension_semantics<arbitrary>], iteration_bounds = array<i64: 2>, scalar_prefetch = 0 : i64, scratch_operands = 1 : i64, tpu.core_type = #tpu.core_type<tc>, window_params = [{pipeline_mode = #tpu.pipeline_mode<synchronous>, transform_indices = @transform_0, window_bounds = array<i64: 16, 32>}, {pipeline_mode = #tpu.pipeline_mode<synchronous>, transform_indices = @transform_1, window_bounds = array<i64: 2, 8>}, {pipeline_mode = #tpu.pipeline_mode<synchronous>, transform_indices = @transform_2, window_bounds = array<i64: 1, 32>}, {pipeline_mode = #tpu.pipeline_mode<synchronous>, transform_indices = @transform_3, window_bounds = array<i64: 1, 32>}, {transform_indices = @transform_4, window_bounds = array<i64: 1, 32, 96>}, {transform_indices = @transform_5, window_bounds = array<i64: 1, 1, 96>}, {transform_indices = @transform_6, window_bounds = array<i64: 1, 32, 32>}, {transform_indices = @transform_7, window_bounds = array<i64: 1, 1, 32>}, {transform_indices = @transform_8, window_bounds = array<i64: 1, 1, 32>}, {transform_indices = @transform_9, window_bounds = array<i64: 1, 1, 32>}, {transform_indices = @transform_10, window_bounds = array<i64: 1, 32, 64>}, {transform_indices = @transform_11, window_bounds = array<i64: 1, 1, 64>}, {transform_indices = @transform_12, window_bounds = array<i64: 1, 64, 32>}, {transform_indices = @transform_13, window_bounds = array<i64: 1, 1, 32>}, {transform_indices = @transform_14, window_bounds = array<i64: 1, 1, 32>}, {transform_indices = @transform_15, window_bounds = array<i64: 1, 1, 32>}, {pipeline_mode = #tpu.pipeline_mode<synchronous>, transform_indices = @transform_16, window_bounds = array<i64: 32, 32>}, {pipeline_mode = #tpu.pipeline_mode<synchronous>, transform_indices = @transform_17, window_bounds = array<i64: 1, 32>}, {pipeline_mode = #tpu.pipeline_mode<synchronous>, transform_indices = @transform_18, window_bounds = array<i64: 32, 128>}, {pipeline_mode = #tpu.pipeline_mode<synchronous>, transform_indices = @transform_19, window_bounds = array<i64: 1, 128>}, {pipeline_mode = #tpu.pipeline_mode<synchronous>, transform_indices = @transform_20, window_bounds = array<i64: 16, 128>}]} {
    %c0_i32 = arith.constant 0 : i32
    %0 = arith.cmpi eq, %arg0, %c0_i32 : i32
    %1 = arith.extui %0 : i1 to i32
    %c0_i32_0 = arith.constant 0 : i32
    %2 = arith.cmpi ne, %1, %c0_i32_0 : i32
    scf.if %2 {
      %c0_102 = arith.constant 0 : index
      %c0_103 = arith.constant 0 : index
      %274 = vector.load %arg1[%c0_102, %c0_103] : memref<16x32xf32, #tpu.memory_space<vmem>>, vector<16x32xf32>
      %c0_104 = arith.constant 0 : index
      %c0_105 = arith.constant 0 : index
      %275 = vector.load %arg3[%c0_104, %c0_105] : memref<1x32xf32, #tpu.memory_space<vmem>>, vector<1x32xf32>
      %c0_106 = arith.constant 0 : index
      %c0_107 = arith.constant 0 : index
      %276 = vector.load %arg4[%c0_106, %c0_107] : memref<1x32xf32, #tpu.memory_space<vmem>>, vector<1x32xf32>
      %cst_108 = arith.constant dense<0.000000e+00> : vector<16xf32>
      %277 = vector.multi_reduction <add>, %274, %cst_108 [1] : vector<16x32xf32> to vector<16xf32>
      %278 = vector.shape_cast %277 : vector<16xf32> to vector<16x1xf32>
      %cst_109 = arith.constant 3.200000e+01 : f32
      %279 = vector.broadcast %cst_109 : f32 to vector<16x1xf32>
      %280 = arith.divf %278, %279 : vector<16x1xf32>
      %281 = vector.broadcast %280 : vector<16x1xf32> to vector<16x32xf32>
      %282 = arith.subf %274, %281 : vector<16x32xf32>
      %283 = arith.mulf %282, %282 : vector<16x32xf32>
      %cst_110 = arith.constant dense<0.000000e+00> : vector<16xf32>
      %284 = vector.multi_reduction <add>, %283, %cst_110 [1] : vector<16x32xf32> to vector<16xf32>
      %285 = vector.shape_cast %284 : vector<16xf32> to vector<16x1xf32>
      %cst_111 = arith.constant 3.200000e+01 : f32
      %286 = vector.broadcast %cst_111 : f32 to vector<16x1xf32>
      %287 = arith.divf %285, %286 : vector<16x1xf32>
      %cst_112 = arith.constant 9.99999996E-13 : f32
      %288 = vector.broadcast %cst_112 : f32 to vector<16x1xf32>
      %289 = arith.addf %287, %288 : vector<16x1xf32>
      %290 = math.rsqrt %289 : vector<16x1xf32>
      %291 = vector.broadcast %290 : vector<16x1xf32> to vector<16x32xf32>
      %292 = arith.mulf %282, %291 : vector<16x32xf32>
      %293 = vector.broadcast %275 : vector<1x32xf32> to vector<16x32xf32>
      %294 = arith.mulf %292, %293 : vector<16x32xf32>
      %295 = vector.broadcast %276 : vector<1x32xf32> to vector<16x32xf32>
      %296 = arith.addf %294, %295 : vector<16x32xf32>
      %c0_113 = arith.constant 0 : index
      %c0_114 = arith.constant 0 : index
      %297 = vector.load %arg22[%c0_113, %c0_114] : memref<16x32xf32, #tpu.memory_space<vmem>>, vector<16x32xf32>
      tpu.vector_store %arg22[%c0_113, %c0_114], %296 {strides = array<i32>} : memref<16x32xf32, #tpu.memory_space<vmem>>, vector<16x32xf32>,
      %cst_115 = arith.constant 0.000000e+00 : f32
      %298 = vector.broadcast %cst_115 : f32 to vector<16x128xf32>
      %c0_116 = arith.constant 0 : index
      %c0_117 = arith.constant 0 : index
      %299 = vector.load %arg21[%c0_116, %c0_117] : memref<16x128xf32, #tpu.memory_space<vmem>>, vector<16x128xf32>
      tpu.vector_store %arg21[%c0_116, %c0_117], %298 {strides = array<i32>} : memref<16x128xf32, #tpu.memory_space<vmem>>, vector<16x128xf32>,
    } else {
    }
    %c0 = arith.constant 0 : index
    %c0_1 = arith.constant 0 : index
    %3 = vector.load %arg22[%c0, %c0_1] : memref<16x32xf32, #tpu.memory_space<vmem>>, vector<16x32xf32>
    %c0_2 = arith.constant 0 : index
    %c0_3 = arith.constant 0 : index
    %c0_4 = arith.constant 0 : index
    %4 = vector.load %arg5[%c0_2, %c0_3, %c0_4] : memref<1x32x96xbf16, #tpu.memory_space<vmem>>, vector<1x32x96xbf16>
    %5 = vector.shape_cast %4 : vector<1x32x96xbf16> to vector<32x96xbf16>
    %6 = arith.truncf %3 : vector<16x32xf32> to vector<16x32xbf16>
    %cst = arith.constant dense<0.000000e+00> : vector<16x96xf32>
    %7 = tpu.matmul %6, %5, %cst {dimension_numbers = #tpu.dot_dimension_numbers<[1], [0], [0], [1], [0, 0, 1, 1], [], []>} : vector<16x32xbf16>, vector<32x96xbf16>, vector<16x96xf32> -> vector<16x96xf32>
    %c0_5 = arith.constant 0 : index
    %c0_6 = arith.constant 0 : index
    %c0_7 = arith.constant 0 : index
    %8 = vector.load %arg6[%c0_5, %c0_6, %c0_7] : memref<1x1x96xf32, #tpu.memory_space<vmem>>, vector<1x1x96xf32>
    %9 = vector.shape_cast %8 : vector<1x1x96xf32> to vector<1x96xf32>
    %10 = vector.broadcast %9 : vector<1x96xf32> to vector<16x96xf32>
    %11 = arith.addf %7, %10 : vector<16x96xf32>
    %12 = vector.extract_strided_slice %11 {offsets = [0, 0], sizes = [16, 32], strides = [1, 1]} : vector<16x96xf32> to vector<16x32xf32>
    %13 = vector.extract_strided_slice %11 {offsets = [0, 32], sizes = [16, 32], strides = [1, 1]} : vector<16x96xf32> to vector<16x32xf32>
    %14 = vector.extract_strided_slice %11 {offsets = [0, 64], sizes = [16, 32], strides = [1, 1]} : vector<16x96xf32> to vector<16x32xf32>
    %c0_8 = arith.constant 0 : index
    %c0_9 = arith.constant 0 : index
    %15 = vector.load %arg2[%c0_8, %c0_9] : memref<2x8xf32, #tpu.memory_space<vmem>>, vector<2x8xf32>
    %cst_10 = arith.constant 1.000000e+00 : f32
    %16 = vector.broadcast %cst_10 : f32 to vector<2x8xf32>
    %17 = arith.subf %16, %15 : vector<2x8xf32>
    %cst_11 = arith.constant -1.000000e+04 : f32
    %18 = vector.broadcast %cst_11 : f32 to vector<2x8xf32>
    %19 = arith.mulf %17, %18 : vector<2x8xf32>
    %20 = vector.extract_strided_slice %12 {offsets = [0, 0], sizes = [8, 32], strides = [1, 1]} : vector<16x32xf32> to vector<8x32xf32>
    %21 = vector.extract_strided_slice %13 {offsets = [0, 0], sizes = [8, 32], strides = [1, 1]} : vector<16x32xf32> to vector<8x32xf32>
    %22 = vector.extract_strided_slice %14 {offsets = [0, 0], sizes = [8, 32], strides = [1, 1]} : vector<16x32xf32> to vector<8x32xf32>
    %23 = vector.extract_strided_slice %19 {offsets = [0, 0], sizes = [1, 8], strides = [1, 1]} : vector<2x8xf32> to vector<1x8xf32>
    %24 = vector.extract_strided_slice %20 {offsets = [0, 0], sizes = [8, 8], strides = [1, 1]} : vector<8x32xf32> to vector<8x8xf32>
    %25 = vector.extract_strided_slice %21 {offsets = [0, 0], sizes = [8, 8], strides = [1, 1]} : vector<8x32xf32> to vector<8x8xf32>
    %26 = vector.extract_strided_slice %22 {offsets = [0, 0], sizes = [8, 8], strides = [1, 1]} : vector<8x32xf32> to vector<8x8xf32>
    %cst_12 = arith.constant dense<0.000000e+00> : vector<8x8xf32>
    %27 = tpu.matmul %24, %25, %cst_12 {dimension_numbers = #tpu.dot_dimension_numbers<[1], [1], [0], [0], [0, 0, 1, 0], [], []>} : vector<8x8xf32>, vector<8x8xf32>, vector<8x8xf32> -> vector<8x8xf32>
    %cst_13 = arith.constant 0.353553385 : f32
    %28 = vector.broadcast %cst_13 : f32 to vector<8x8xf32>
    %29 = arith.mulf %27, %28 : vector<8x8xf32>
    %30 = vector.broadcast %23 : vector<1x8xf32> to vector<8x8xf32>
    %31 = arith.addf %29, %30 : vector<8x8xf32>
    %cst_14 = arith.constant dense<0xFF800000> : vector<8xf32>
    %32 = vector.multi_reduction <maximumf>, %31, %cst_14 [1] : vector<8x8xf32> to vector<8xf32>
    %33 = vector.shape_cast %32 : vector<8xf32> to vector<8x1xf32>
    %34 = vector.broadcast %33 : vector<8x1xf32> to vector<8x8xf32>
    %35 = arith.subf %31, %34 : vector<8x8xf32>
    %36 = math.exp %35 : vector<8x8xf32>
    %cst_15 = arith.constant dense<0.000000e+00> : vector<8xf32>
    %37 = vector.multi_reduction <add>, %36, %cst_15 [1] : vector<8x8xf32> to vector<8xf32>
    %38 = vector.shape_cast %37 : vector<8xf32> to vector<8x1xf32>
    %39 = tpu.reciprocal %38 {approx = true} : vector<8x1xf32> -> vector<8x1xf32>
    %40 = vector.broadcast %39 : vector<8x1xf32> to vector<8x8xf32>
    %41 = arith.mulf %36, %40 : vector<8x8xf32>
    %cst_16 = arith.constant dense<0.000000e+00> : vector<8x8xf32>
    %42 = tpu.matmul %41, %26, %cst_16 {dimension_numbers = #tpu.dot_dimension_numbers<[1], [0], [0], [1], [0, 0, 1, 1], [], []>} : vector<8x8xf32>, vector<8x8xf32>, vector<8x8xf32> -> vector<8x8xf32>
    %43 = vector.extract_strided_slice %20 {offsets = [0, 8], sizes = [8, 8], strides = [1, 1]} : vector<8x32xf32> to vector<8x8xf32>
    %44 = vector.extract_strided_slice %21 {offsets = [0, 8], sizes = [8, 8], strides = [1, 1]} : vector<8x32xf32> to vector<8x8xf32>
    %45 = vector.extract_strided_slice %22 {offsets = [0, 8], sizes = [8, 8], strides = [1, 1]} : vector<8x32xf32> to vector<8x8xf32>
    %cst_17 = arith.constant dense<0.000000e+00> : vector<8x8xf32>
    %46 = tpu.matmul %43, %44, %cst_17 {dimension_numbers = #tpu.dot_dimension_numbers<[1], [1], [0], [0], [0, 0, 1, 0], [], []>} : vector<8x8xf32>, vector<8x8xf32>, vector<8x8xf32> -> vector<8x8xf32>
    %cst_18 = arith.constant 0.353553385 : f32
    %47 = vector.broadcast %cst_18 : f32 to vector<8x8xf32>
    %48 = arith.mulf %46, %47 : vector<8x8xf32>
    %49 = vector.broadcast %23 : vector<1x8xf32> to vector<8x8xf32>
    %50 = arith.addf %48, %49 : vector<8x8xf32>
    %cst_19 = arith.constant dense<0xFF800000> : vector<8xf32>
    %51 = vector.multi_reduction <maximumf>, %50, %cst_19 [1] : vector<8x8xf32> to vector<8xf32>
    %52 = vector.shape_cast %51 : vector<8xf32> to vector<8x1xf32>
    %53 = vector.broadcast %52 : vector<8x1xf32> to vector<8x8xf32>
    %54 = arith.subf %50, %53 : vector<8x8xf32>
    %55 = math.exp %54 : vector<8x8xf32>
    %cst_20 = arith.constant dense<0.000000e+00> : vector<8xf32>
    %56 = vector.multi_reduction <add>, %55, %cst_20 [1] : vector<8x8xf32> to vector<8xf32>
    %57 = vector.shape_cast %56 : vector<8xf32> to vector<8x1xf32>
    %58 = tpu.reciprocal %57 {approx = true} : vector<8x1xf32> -> vector<8x1xf32>
    %59 = vector.broadcast %58 : vector<8x1xf32> to vector<8x8xf32>
    %60 = arith.mulf %55, %59 : vector<8x8xf32>
    %cst_21 = arith.constant dense<0.000000e+00> : vector<8x8xf32>
    %61 = tpu.matmul %60, %45, %cst_21 {dimension_numbers = #tpu.dot_dimension_numbers<[1], [0], [0], [1], [0, 0, 1, 1], [], []>} : vector<8x8xf32>, vector<8x8xf32>, vector<8x8xf32> -> vector<8x8xf32>
    %62 = vector.extract_strided_slice %20 {offsets = [0, 16], sizes = [8, 8], strides = [1, 1]} : vector<8x32xf32> to vector<8x8xf32>
    %63 = vector.extract_strided_slice %21 {offsets = [0, 16], sizes = [8, 8], strides = [1, 1]} : vector<8x32xf32> to vector<8x8xf32>
    %64 = vector.extract_strided_slice %22 {offsets = [0, 16], sizes = [8, 8], strides = [1, 1]} : vector<8x32xf32> to vector<8x8xf32>
    %cst_22 = arith.constant dense<0.000000e+00> : vector<8x8xf32>
    %65 = tpu.matmul %62, %63, %cst_22 {dimension_numbers = #tpu.dot_dimension_numbers<[1], [1], [0], [0], [0, 0, 1, 0], [], []>} : vector<8x8xf32>, vector<8x8xf32>, vector<8x8xf32> -> vector<8x8xf32>
    %cst_23 = arith.constant 0.353553385 : f32
    %66 = vector.broadcast %cst_23 : f32 to vector<8x8xf32>
    %67 = arith.mulf %65, %66 : vector<8x8xf32>
    %68 = vector.broadcast %23 : vector<1x8xf32> to vector<8x8xf32>
    %69 = arith.addf %67, %68 : vector<8x8xf32>
    %cst_24 = arith.constant dense<0xFF800000> : vector<8xf32>
    %70 = vector.multi_reduction <maximumf>, %69, %cst_24 [1] : vector<8x8xf32> to vector<8xf32>
    %71 = vector.shape_cast %70 : vector<8xf32> to vector<8x1xf32>
    %72 = vector.broadcast %71 : vector<8x1xf32> to vector<8x8xf32>
    %73 = arith.subf %69, %72 : vector<8x8xf32>
    %74 = math.exp %73 : vector<8x8xf32>
    %cst_25 = arith.constant dense<0.000000e+00> : vector<8xf32>
    %75 = vector.multi_reduction <add>, %74, %cst_25 [1] : vector<8x8xf32> to vector<8xf32>
    %76 = vector.shape_cast %75 : vector<8xf32> to vector<8x1xf32>
    %77 = tpu.reciprocal %76 {approx = true} : vector<8x1xf32> -> vector<8x1xf32>
    %78 = vector.broadcast %77 : vector<8x1xf32> to vector<8x8xf32>
    %79 = arith.mulf %74, %78 : vector<8x8xf32>
    %cst_26 = arith.constant dense<0.000000e+00> : vector<8x8xf32>
    %80 = tpu.matmul %79, %64, %cst_26 {dimension_numbers = #tpu.dot_dimension_numbers<[1], [0], [0], [1], [0, 0, 1, 1], [], []>} : vector<8x8xf32>, vector<8x8xf32>, vector<8x8xf32> -> vector<8x8xf32>
    %81 = vector.extract_strided_slice %20 {offsets = [0, 24], sizes = [8, 8], strides = [1, 1]} : vector<8x32xf32> to vector<8x8xf32>
    %82 = vector.extract_strided_slice %21 {offsets = [0, 24], sizes = [8, 8], strides = [1, 1]} : vector<8x32xf32> to vector<8x8xf32>
    %83 = vector.extract_strided_slice %22 {offsets = [0, 24], sizes = [8, 8], strides = [1, 1]} : vector<8x32xf32> to vector<8x8xf32>
    %cst_27 = arith.constant dense<0.000000e+00> : vector<8x8xf32>
    %84 = tpu.matmul %81, %82, %cst_27 {dimension_numbers = #tpu.dot_dimension_numbers<[1], [1], [0], [0], [0, 0, 1, 0], [], []>} : vector<8x8xf32>, vector<8x8xf32>, vector<8x8xf32> -> vector<8x8xf32>
    %cst_28 = arith.constant 0.353553385 : f32
    %85 = vector.broadcast %cst_28 : f32 to vector<8x8xf32>
    %86 = arith.mulf %84, %85 : vector<8x8xf32>
    %87 = vector.broadcast %23 : vector<1x8xf32> to vector<8x8xf32>
    %88 = arith.addf %86, %87 : vector<8x8xf32>
    %cst_29 = arith.constant dense<0xFF800000> : vector<8xf32>
    %89 = vector.multi_reduction <maximumf>, %88, %cst_29 [1] : vector<8x8xf32> to vector<8xf32>
    %90 = vector.shape_cast %89 : vector<8xf32> to vector<8x1xf32>
    %91 = vector.broadcast %90 : vector<8x1xf32> to vector<8x8xf32>
    %92 = arith.subf %88, %91 : vector<8x8xf32>
    %93 = math.exp %92 : vector<8x8xf32>
    %cst_30 = arith.constant dense<0.000000e+00> : vector<8xf32>
    %94 = vector.multi_reduction <add>, %93, %cst_30 [1] : vector<8x8xf32> to vector<8xf32>
    %95 = vector.shape_cast %94 : vector<8xf32> to vector<8x1xf32>
    %96 = tpu.reciprocal %95 {approx = true} : vector<8x1xf32> -> vector<8x1xf32>
    %97 = vector.broadcast %96 : vector<8x1xf32> to vector<8x8xf32>
    %98 = arith.mulf %93, %97 : vector<8x8xf32>
    %cst_31 = arith.constant dense<0.000000e+00> : vector<8x8xf32>
    %99 = tpu.matmul %98, %83, %cst_31 {dimension_numbers = #tpu.dot_dimension_numbers<[1], [0], [0], [1], [0, 0, 1, 1], [], []>} : vector<8x8xf32>, vector<8x8xf32>, vector<8x8xf32> -> vector<8x8xf32>
    %100 = tpu.concatenate %42, %61, %80, %99 in 1 : vector<8x8xf32>, vector<8x8xf32>, vector<8x8xf32>, vector<8x8xf32> -> vector<8x32xf32>
    %101 = vector.extract_strided_slice %12 {offsets = [8, 0], sizes = [8, 32], strides = [1, 1]} : vector<16x32xf32> to vector<8x32xf32>
    %102 = vector.extract_strided_slice %13 {offsets = [8, 0], sizes = [8, 32], strides = [1, 1]} : vector<16x32xf32> to vector<8x32xf32>
    %103 = vector.extract_strided_slice %14 {offsets = [8, 0], sizes = [8, 32], strides = [1, 1]} : vector<16x32xf32> to vector<8x32xf32>
    %104 = vector.extract_strided_slice %19 {offsets = [1, 0], sizes = [1, 8], strides = [1, 1]} : vector<2x8xf32> to vector<1x8xf32>
    %105 = vector.extract_strided_slice %101 {offsets = [0, 0], sizes = [8, 8], strides = [1, 1]} : vector<8x32xf32> to vector<8x8xf32>
    %106 = vector.extract_strided_slice %102 {offsets = [0, 0], sizes = [8, 8], strides = [1, 1]} : vector<8x32xf32> to vector<8x8xf32>
    %107 = vector.extract_strided_slice %103 {offsets = [0, 0], sizes = [8, 8], strides = [1, 1]} : vector<8x32xf32> to vector<8x8xf32>
    %cst_32 = arith.constant dense<0.000000e+00> : vector<8x8xf32>
    %108 = tpu.matmul %105, %106, %cst_32 {dimension_numbers = #tpu.dot_dimension_numbers<[1], [1], [0], [0], [0, 0, 1, 0], [], []>} : vector<8x8xf32>, vector<8x8xf32>, vector<8x8xf32> -> vector<8x8xf32>
    %cst_33 = arith.constant 0.353553385 : f32
    %109 = vector.broadcast %cst_33 : f32 to vector<8x8xf32>
    %110 = arith.mulf %108, %109 : vector<8x8xf32>
    %111 = vector.broadcast %104 : vector<1x8xf32> to vector<8x8xf32>
    %112 = arith.addf %110, %111 : vector<8x8xf32>
    %cst_34 = arith.constant dense<0xFF800000> : vector<8xf32>
    %113 = vector.multi_reduction <maximumf>, %112, %cst_34 [1] : vector<8x8xf32> to vector<8xf32>
    %114 = vector.shape_cast %113 : vector<8xf32> to vector<8x1xf32>
    %115 = vector.broadcast %114 : vector<8x1xf32> to vector<8x8xf32>
    %116 = arith.subf %112, %115 : vector<8x8xf32>
    %117 = math.exp %116 : vector<8x8xf32>
    %cst_35 = arith.constant dense<0.000000e+00> : vector<8xf32>
    %118 = vector.multi_reduction <add>, %117, %cst_35 [1] : vector<8x8xf32> to vector<8xf32>
    %119 = vector.shape_cast %118 : vector<8xf32> to vector<8x1xf32>
    %120 = tpu.reciprocal %119 {approx = true} : vector<8x1xf32> -> vector<8x1xf32>
    %121 = vector.broadcast %120 : vector<8x1xf32> to vector<8x8xf32>
    %122 = arith.mulf %117, %121 : vector<8x8xf32>
    %cst_36 = arith.constant dense<0.000000e+00> : vector<8x8xf32>
    %123 = tpu.matmul %122, %107, %cst_36 {dimension_numbers = #tpu.dot_dimension_numbers<[1], [0], [0], [1], [0, 0, 1, 1], [], []>} : vector<8x8xf32>, vector<8x8xf32>, vector<8x8xf32> -> vector<8x8xf32>
    %124 = vector.extract_strided_slice %101 {offsets = [0, 8], sizes = [8, 8], strides = [1, 1]} : vector<8x32xf32> to vector<8x8xf32>
    %125 = vector.extract_strided_slice %102 {offsets = [0, 8], sizes = [8, 8], strides = [1, 1]} : vector<8x32xf32> to vector<8x8xf32>
    %126 = vector.extract_strided_slice %103 {offsets = [0, 8], sizes = [8, 8], strides = [1, 1]} : vector<8x32xf32> to vector<8x8xf32>
    %cst_37 = arith.constant dense<0.000000e+00> : vector<8x8xf32>
    %127 = tpu.matmul %124, %125, %cst_37 {dimension_numbers = #tpu.dot_dimension_numbers<[1], [1], [0], [0], [0, 0, 1, 0], [], []>} : vector<8x8xf32>, vector<8x8xf32>, vector<8x8xf32> -> vector<8x8xf32>
    %cst_38 = arith.constant 0.353553385 : f32
    %128 = vector.broadcast %cst_38 : f32 to vector<8x8xf32>
    %129 = arith.mulf %127, %128 : vector<8x8xf32>
    %130 = vector.broadcast %104 : vector<1x8xf32> to vector<8x8xf32>
    %131 = arith.addf %129, %130 : vector<8x8xf32>
    %cst_39 = arith.constant dense<0xFF800000> : vector<8xf32>
    %132 = vector.multi_reduction <maximumf>, %131, %cst_39 [1] : vector<8x8xf32> to vector<8xf32>
    %133 = vector.shape_cast %132 : vector<8xf32> to vector<8x1xf32>
    %134 = vector.broadcast %133 : vector<8x1xf32> to vector<8x8xf32>
    %135 = arith.subf %131, %134 : vector<8x8xf32>
    %136 = math.exp %135 : vector<8x8xf32>
    %cst_40 = arith.constant dense<0.000000e+00> : vector<8xf32>
    %137 = vector.multi_reduction <add>, %136, %cst_40 [1] : vector<8x8xf32> to vector<8xf32>
    %138 = vector.shape_cast %137 : vector<8xf32> to vector<8x1xf32>
    %139 = tpu.reciprocal %138 {approx = true} : vector<8x1xf32> -> vector<8x1xf32>
    %140 = vector.broadcast %139 : vector<8x1xf32> to vector<8x8xf32>
    %141 = arith.mulf %136, %140 : vector<8x8xf32>
    %cst_41 = arith.constant dense<0.000000e+00> : vector<8x8xf32>
    %142 = tpu.matmul %141, %126, %cst_41 {dimension_numbers = #tpu.dot_dimension_numbers<[1], [0], [0], [1], [0, 0, 1, 1], [], []>} : vector<8x8xf32>, vector<8x8xf32>, vector<8x8xf32> -> vector<8x8xf32>
    %143 = vector.extract_strided_slice %101 {offsets = [0, 16], sizes = [8, 8], strides = [1, 1]} : vector<8x32xf32> to vector<8x8xf32>
    %144 = vector.extract_strided_slice %102 {offsets = [0, 16], sizes = [8, 8], strides = [1, 1]} : vector<8x32xf32> to vector<8x8xf32>
    %145 = vector.extract_strided_slice %103 {offsets = [0, 16], sizes = [8, 8], strides = [1, 1]} : vector<8x32xf32> to vector<8x8xf32>
    %cst_42 = arith.constant dense<0.000000e+00> : vector<8x8xf32>
    %146 = tpu.matmul %143, %144, %cst_42 {dimension_numbers = #tpu.dot_dimension_numbers<[1], [1], [0], [0], [0, 0, 1, 0], [], []>} : vector<8x8xf32>, vector<8x8xf32>, vector<8x8xf32> -> vector<8x8xf32>
    %cst_43 = arith.constant 0.353553385 : f32
    %147 = vector.broadcast %cst_43 : f32 to vector<8x8xf32>
    %148 = arith.mulf %146, %147 : vector<8x8xf32>
    %149 = vector.broadcast %104 : vector<1x8xf32> to vector<8x8xf32>
    %150 = arith.addf %148, %149 : vector<8x8xf32>
    %cst_44 = arith.constant dense<0xFF800000> : vector<8xf32>
    %151 = vector.multi_reduction <maximumf>, %150, %cst_44 [1] : vector<8x8xf32> to vector<8xf32>
    %152 = vector.shape_cast %151 : vector<8xf32> to vector<8x1xf32>
    %153 = vector.broadcast %152 : vector<8x1xf32> to vector<8x8xf32>
    %154 = arith.subf %150, %153 : vector<8x8xf32>
    %155 = math.exp %154 : vector<8x8xf32>
    %cst_45 = arith.constant dense<0.000000e+00> : vector<8xf32>
    %156 = vector.multi_reduction <add>, %155, %cst_45 [1] : vector<8x8xf32> to vector<8xf32>
    %157 = vector.shape_cast %156 : vector<8xf32> to vector<8x1xf32>
    %158 = tpu.reciprocal %157 {approx = true} : vector<8x1xf32> -> vector<8x1xf32>
    %159 = vector.broadcast %158 : vector<8x1xf32> to vector<8x8xf32>
    %160 = arith.mulf %155, %159 : vector<8x8xf32>
    %cst_46 = arith.constant dense<0.000000e+00> : vector<8x8xf32>
    %161 = tpu.matmul %160, %145, %cst_46 {dimension_numbers = #tpu.dot_dimension_numbers<[1], [0], [0], [1], [0, 0, 1, 1], [], []>} : vector<8x8xf32>, vector<8x8xf32>, vector<8x8xf32> -> vector<8x8xf32>
    %162 = vector.extract_strided_slice %101 {offsets = [0, 24], sizes = [8, 8], strides = [1, 1]} : vector<8x32xf32> to vector<8x8xf32>
    %163 = vector.extract_strided_slice %102 {offsets = [0, 24], sizes = [8, 8], strides = [1, 1]} : vector<8x32xf32> to vector<8x8xf32>
    %164 = vector.extract_strided_slice %103 {offsets = [0, 24], sizes = [8, 8], strides = [1, 1]} : vector<8x32xf32> to vector<8x8xf32>
    %cst_47 = arith.constant dense<0.000000e+00> : vector<8x8xf32>
    %165 = tpu.matmul %162, %163, %cst_47 {dimension_numbers = #tpu.dot_dimension_numbers<[1], [1], [0], [0], [0, 0, 1, 0], [], []>} : vector<8x8xf32>, vector<8x8xf32>, vector<8x8xf32> -> vector<8x8xf32>
    %cst_48 = arith.constant 0.353553385 : f32
    %166 = vector.broadcast %cst_48 : f32 to vector<8x8xf32>
    %167 = arith.mulf %165, %166 : vector<8x8xf32>
    %168 = vector.broadcast %104 : vector<1x8xf32> to vector<8x8xf32>
    %169 = arith.addf %167, %168 : vector<8x8xf32>
    %cst_49 = arith.constant dense<0xFF800000> : vector<8xf32>
    %170 = vector.multi_reduction <maximumf>, %169, %cst_49 [1] : vector<8x8xf32> to vector<8xf32>
    %171 = vector.shape_cast %170 : vector<8xf32> to vector<8x1xf32>
    %172 = vector.broadcast %171 : vector<8x1xf32> to vector<8x8xf32>
    %173 = arith.subf %169, %172 : vector<8x8xf32>
    %174 = math.exp %173 : vector<8x8xf32>
    %cst_50 = arith.constant dense<0.000000e+00> : vector<8xf32>
    %175 = vector.multi_reduction <add>, %174, %cst_50 [1] : vector<8x8xf32> to vector<8xf32>
    %176 = vector.shape_cast %175 : vector<8xf32> to vector<8x1xf32>
    %177 = tpu.reciprocal %176 {approx = true} : vector<8x1xf32> -> vector<8x1xf32>
    %178 = vector.broadcast %177 : vector<8x1xf32> to vector<8x8xf32>
    %179 = arith.mulf %174, %178 : vector<8x8xf32>
    %cst_51 = arith.constant dense<0.000000e+00> : vector<8x8xf32>
    %180 = tpu.matmul %179, %164, %cst_51 {dimension_numbers = #tpu.dot_dimension_numbers<[1], [0], [0], [1], [0, 0, 1, 1], [], []>} : vector<8x8xf32>, vector<8x8xf32>, vector<8x8xf32> -> vector<8x8xf32>
    %181 = tpu.concatenate %123, %142, %161, %180 in 1 : vector<8x8xf32>, vector<8x8xf32>, vector<8x8xf32>, vector<8x8xf32> -> vector<8x32xf32>
    %182 = tpu.concatenate %100, %181 in 0 : vector<8x32xf32>, vector<8x32xf32> -> vector<16x32xf32>
    %c0_52 = arith.constant 0 : index
    %c0_53 = arith.constant 0 : index
    %c0_54 = arith.constant 0 : index
    %183 = vector.load %arg7[%c0_52, %c0_53, %c0_54] : memref<1x32x32xbf16, #tpu.memory_space<vmem>>, vector<1x32x32xbf16>
    %184 = vector.shape_cast %183 : vector<1x32x32xbf16> to vector<32x32xbf16>
    %185 = arith.truncf %182 : vector<16x32xf32> to vector<16x32xbf16>
    %cst_55 = arith.constant dense<0.000000e+00> : vector<16x32xf32>
    %186 = tpu.matmul %185, %184, %cst_55 {dimension_numbers = #tpu.dot_dimension_numbers<[1], [0], [0], [1], [0, 0, 1, 1], [], []>} : vector<16x32xbf16>, vector<32x32xbf16>, vector<16x32xf32> -> vector<16x32xf32>
    %c0_56 = arith.constant 0 : index
    %c0_57 = arith.constant 0 : index
    %c0_58 = arith.constant 0 : index
    %187 = vector.load %arg8[%c0_56, %c0_57, %c0_58] : memref<1x1x32xf32, #tpu.memory_space<vmem>>, vector<1x1x32xf32>
    %188 = vector.shape_cast %187 : vector<1x1x32xf32> to vector<1x32xf32>
    %189 = vector.broadcast %188 : vector<1x32xf32> to vector<16x32xf32>
    %190 = arith.addf %186, %189 : vector<16x32xf32>
    %191 = arith.addf %3, %190 : vector<16x32xf32>
    %c0_59 = arith.constant 0 : index
    %c0_60 = arith.constant 0 : index
    %c0_61 = arith.constant 0 : index
    %192 = vector.load %arg9[%c0_59, %c0_60, %c0_61] : memref<1x1x32xf32, #tpu.memory_space<vmem>>, vector<1x1x32xf32>
    %193 = vector.shape_cast %192 : vector<1x1x32xf32> to vector<1x32xf32>
    %c0_62 = arith.constant 0 : index
    %c0_63 = arith.constant 0 : index
    %c0_64 = arith.constant 0 : index
    %194 = vector.load %arg10[%c0_62, %c0_63, %c0_64] : memref<1x1x32xf32, #tpu.memory_space<vmem>>, vector<1x1x32xf32>
    %195 = vector.shape_cast %194 : vector<1x1x32xf32> to vector<1x32xf32>
    %cst_65 = arith.constant dense<0.000000e+00> : vector<16xf32>
    %196 = vector.multi_reduction <add>, %191, %cst_65 [1] : vector<16x32xf32> to vector<16xf32>
    %197 = vector.shape_cast %196 : vector<16xf32> to vector<16x1xf32>
    %cst_66 = arith.constant 3.200000e+01 : f32
    %198 = vector.broadcast %cst_66 : f32 to vector<16x1xf32>
    %199 = arith.divf %197, %198 : vector<16x1xf32>
    %200 = vector.broadcast %199 : vector<16x1xf32> to vector<16x32xf32>
    %201 = arith.subf %191, %200 : vector<16x32xf32>
    %202 = arith.mulf %201, %201 : vector<16x32xf32>
    %cst_67 = arith.constant dense<0.000000e+00> : vector<16xf32>
    %203 = vector.multi_reduction <add>, %202, %cst_67 [1] : vector<16x32xf32> to vector<16xf32>
    %204 = vector.shape_cast %203 : vector<16xf32> to vector<16x1xf32>
    %cst_68 = arith.constant 3.200000e+01 : f32
    %205 = vector.broadcast %cst_68 : f32 to vector<16x1xf32>
    %206 = arith.divf %204, %205 : vector<16x1xf32>
    %cst_69 = arith.constant 9.99999996E-13 : f32
    %207 = vector.broadcast %cst_69 : f32 to vector<16x1xf32>
    %208 = arith.addf %206, %207 : vector<16x1xf32>
    %209 = math.rsqrt %208 : vector<16x1xf32>
    %210 = vector.broadcast %209 : vector<16x1xf32> to vector<16x32xf32>
    %211 = arith.mulf %201, %210 : vector<16x32xf32>
    %212 = vector.broadcast %193 : vector<1x32xf32> to vector<16x32xf32>
    %213 = arith.mulf %211, %212 : vector<16x32xf32>
    %214 = vector.broadcast %195 : vector<1x32xf32> to vector<16x32xf32>
    %215 = arith.addf %213, %214 : vector<16x32xf32>
    %c0_70 = arith.constant 0 : index
    %c0_71 = arith.constant 0 : index
    %c0_72 = arith.constant 0 : index
    %216 = vector.load %arg11[%c0_70, %c0_71, %c0_72] : memref<1x32x64xbf16, #tpu.memory_space<vmem>>, vector<1x32x64xbf16>
    %217 = vector.shape_cast %216 : vector<1x32x64xbf16> to vector<32x64xbf16>
    %218 = arith.truncf %215 : vector<16x32xf32> to vector<16x32xbf16>
    %cst_73 = arith.constant dense<0.000000e+00> : vector<16x64xf32>
    %219 = tpu.matmul %218, %217, %cst_73 {dimension_numbers = #tpu.dot_dimension_numbers<[1], [0], [0], [1], [0, 0, 1, 1], [], []>} : vector<16x32xbf16>, vector<32x64xbf16>, vector<16x64xf32> -> vector<16x64xf32>
    %c0_74 = arith.constant 0 : index
    %c0_75 = arith.constant 0 : index
    %c0_76 = arith.constant 0 : index
    %220 = vector.load %arg12[%c0_74, %c0_75, %c0_76] : memref<1x1x64xf32, #tpu.memory_space<vmem>>, vector<1x1x64xf32>
    %221 = vector.shape_cast %220 : vector<1x1x64xf32> to vector<1x64xf32>
    %222 = vector.broadcast %221 : vector<1x64xf32> to vector<16x64xf32>
    %223 = arith.addf %219, %222 : vector<16x64xf32>
    %cst_77 = arith.constant 5.000000e-01 : f32
    %224 = vector.broadcast %cst_77 : f32 to vector<16x64xf32>
    %225 = arith.mulf %224, %223 : vector<16x64xf32>
    %cst_78 = arith.constant 4.471500e-02 : f32
    %226 = vector.broadcast %cst_78 : f32 to vector<16x64xf32>
    %227 = arith.mulf %226, %223 : vector<16x64xf32>
    %228 = arith.mulf %227, %223 : vector<16x64xf32>
    %229 = arith.mulf %228, %223 : vector<16x64xf32>
    %230 = arith.addf %223, %229 : vector<16x64xf32>
    %cst_79 = arith.constant 0.797884583 : f32
    %231 = vector.broadcast %cst_79 : f32 to vector<16x64xf32>
    %232 = arith.mulf %231, %230 : vector<16x64xf32>
    %233 = math.tanh %232 : vector<16x64xf32>
    %cst_80 = arith.constant 1.000000e+00 : f32
    %234 = vector.broadcast %cst_80 : f32 to vector<16x64xf32>
    %235 = arith.addf %234, %233 : vector<16x64xf32>
    %236 = arith.mulf %225, %235 : vector<16x64xf32>
    %c0_81 = arith.constant 0 : index
    %c0_82 = arith.constant 0 : index
    %c0_83 = arith.constant 0 : index
    %237 = vector.load %arg13[%c0_81, %c0_82, %c0_83] : memref<1x64x32xbf16, #tpu.memory_space<vmem>>, vector<1x64x32xbf16>
    %238 = vector.shape_cast %237 : vector<1x64x32xbf16> to vector<64x32xbf16>
    %239 = arith.truncf %236 : vector<16x64xf32> to vector<16x64xbf16>
    %cst_84 = arith.constant dense<0.000000e+00> : vector<16x32xf32>
    %240 = tpu.matmul %239, %238, %cst_84 {dimension_numbers = #tpu.dot_dimension_numbers<[1], [0], [0], [1], [0, 0, 1, 1], [], []>} : vector<16x64xbf16>, vector<64x32xbf16>, vector<16x32xf32> -> vector<16x32xf32>
    %c0_85 = arith.constant 0 : index
    %c0_86 = arith.constant 0 : index
    %c0_87 = arith.constant 0 : index
    %241 = vector.load %arg14[%c0_85, %c0_86, %c0_87] : memref<1x1x32xf32, #tpu.memory_space<vmem>>, vector<1x1x32xf32>
    %242 = vector.shape_cast %241 : vector<1x1x32xf32> to vector<1x32xf32>
    %243 = vector.broadcast %242 : vector<1x32xf32> to vector<16x32xf32>
    %244 = arith.addf %240, %243 : vector<16x32xf32>
    %245 = arith.addf %215, %244 : vector<16x32xf32>
    %c0_88 = arith.constant 0 : index
    %c0_89 = arith.constant 0 : index
    %c0_90 = arith.constant 0 : index
    %246 = vector.load %arg15[%c0_88, %c0_89, %c0_90] : memref<1x1x32xf32, #tpu.memory_space<vmem>>, vector<1x1x32xf32>
    %247 = vector.shape_cast %246 : vector<1x1x32xf32> to vector<1x32xf32>
    %c0_91 = arith.constant 0 : index
    %c0_92 = arith.constant 0 : index
    %c0_93 = arith.constant 0 : index
    %248 = vector.load %arg16[%c0_91, %c0_92, %c0_93] : memref<1x1x32xf32, #tpu.memory_space<vmem>>, vector<1x1x32xf32>
    %249 = vector.shape_cast %248 : vector<1x1x32xf32> to vector<1x32xf32>
    %cst_94 = arith.constant dense<0.000000e+00> : vector<16xf32>
    %250 = vector.multi_reduction <add>, %245, %cst_94 [1] : vector<16x32xf32> to vector<16xf32>
    %251 = vector.shape_cast %250 : vector<16xf32> to vector<16x1xf32>
    %cst_95 = arith.constant 3.200000e+01 : f32
    %252 = vector.broadcast %cst_95 : f32 to vector<16x1xf32>
    %253 = arith.divf %251, %252 : vector<16x1xf32>
    %254 = vector.broadcast %253 : vector<16x1xf32> to vector<16x32xf32>
    %255 = arith.subf %245, %254 : vector<16x32xf32>
    %256 = arith.mulf %255, %255 : vector<16x32xf32>
    %cst_96 = arith.constant dense<0.000000e+00> : vector<16xf32>
    %257 = vector.multi_reduction <add>, %256, %cst_96 [1] : vector<16x32xf32> to vector<16xf32>
    %258 = vector.shape_cast %257 : vector<16xf32> to vector<16x1xf32>
    %cst_97 = arith.constant 3.200000e+01 : f32
    %259 = vector.broadcast %cst_97 : f32 to vector<16x1xf32>
    %260 = arith.divf %258, %259 : vector<16x1xf32>
    %cst_98 = arith.constant 9.99999996E-13 : f32
    %261 = vector.broadcast %cst_98 : f32 to vector<16x1xf32>
    %262 = arith.addf %260, %261 : vector<16x1xf32>
    %263 = math.rsqrt %262 : vector<16x1xf32>
    %264 = vector.broadcast %263 : vector<16x1xf32> to vector<16x32xf32>
    %265 = arith.mulf %255, %264 : vector<16x32xf32>
    %266 = vector.broadcast %247 : vector<1x32xf32> to vector<16x32xf32>
    %267 = arith.mulf %265, %266 : vector<16x32xf32>
    %268 = vector.broadcast %249 : vector<1x32xf32> to vector<16x32xf32>
    %269 = arith.addf %267, %268 : vector<16x32xf32>
    %c0_99 = arith.constant 0 : index
    %c0_100 = arith.constant 0 : index
    %270 = vector.load %arg22[%c0_99, %c0_100] : memref<16x32xf32, #tpu.memory_space<vmem>>, vector<16x32xf32>
    tpu.vector_store %arg22[%c0_99, %c0_100], %269 {strides = array<i32>} : memref<16x32xf32, #tpu.memory_space<vmem>>, vector<16x32xf32>,
    %c1_i32 = arith.constant 1 : i32
    %271 = arith.cmpi eq, %arg0, %c1_i32 : i32
    %272 = arith.extui %271 : i1 to i32
    %c0_i32_101 = arith.constant 0 : i32
    %273 = arith.cmpi ne, %272, %c0_i32_101 : i32
    scf.if %273 {
      %c0_102 = arith.constant 0 : index
      %c0_103 = arith.constant 0 : index
      %274 = vector.load %arg17[%c0_102, %c0_103] : memref<32x32xbf16, #tpu.memory_space<vmem>>, vector<32x32xbf16>
      %275 = arith.truncf %269 : vector<16x32xf32> to vector<16x32xbf16>
      %cst_104 = arith.constant dense<0.000000e+00> : vector<16x32xf32>
      %276 = tpu.matmul %275, %274, %cst_104 {dimension_numbers = #tpu.dot_dimension_numbers<[1], [0], [0], [1], [0, 0, 1, 1], [], []>} : vector<16x32xbf16>, vector<32x32xbf16>, vector<16x32xf32> -> vector<16x32xf32>
      %c0_105 = arith.constant 0 : index
      %c0_106 = arith.constant 0 : index
      %277 = vector.load %arg18[%c0_105, %c0_106] : memref<1x32xf32, #tpu.memory_space<vmem>>, vector<1x32xf32>
      %278 = vector.broadcast %277 : vector<1x32xf32> to vector<16x32xf32>
      %279 = arith.addf %276, %278 : vector<16x32xf32>
      %280 = math.tanh %279 : vector<16x32xf32>
      %c0_107 = arith.constant 0 : index
      %c0_108 = arith.constant 0 : index
      %281 = vector.load %arg19[%c0_107, %c0_108] : memref<32x128xf32, #tpu.memory_space<vmem>>, vector<32x128xf32>
      %cst_109 = arith.constant dense<0.000000e+00> : vector<16x128xf32>
      %282 = tpu.matmul %280, %281, %cst_109 {dimension_numbers = #tpu.dot_dimension_numbers<[1], [0], [0], [1], [0, 0, 1, 1], [], []>} : vector<16x32xf32>, vector<32x128xf32>, vector<16x128xf32> -> vector<16x128xf32>
      %c0_110 = arith.constant 0 : index
      %c0_111 = arith.constant 0 : index
      %283 = vector.load %arg20[%c0_110, %c0_111] : memref<1x128xf32, #tpu.memory_space<vmem>>, vector<1x128xf32>
      %284 = vector.broadcast %283 : vector<1x128xf32> to vector<16x128xf32>
      %285 = arith.addf %282, %284 : vector<16x128xf32>
      %c0_112 = arith.constant 0 : index
      %c0_113 = arith.constant 0 : index
      %286 = vector.load %arg21[%c0_112, %c0_113] : memref<16x128xf32, #tpu.memory_space<vmem>>, vector<16x128xf32>
      tpu.vector_store %arg21[%c0_112, %c0_113], %285 {strides = array<i32>} : memref<16x128xf32, #tpu.memory_space<vmem>>, vector<16x128xf32>,
    } else {
    }
    return
  }
  func.func @transform_0(%arg0: i32) -> (i32, i32) {
    %c0_i32 = arith.constant 0 : i32
    %c0_i32_0 = arith.constant 0 : i32
    %c0_i32_1 = arith.constant 0 : i32
    return %c0_i32, %c0_i32_0 : i32, i32
  }
  func.func @transform_1(%arg0: i32) -> (i32, i32) {
    %c0_i32 = arith.constant 0 : i32
    %c0_i32_0 = arith.constant 0 : i32
    %c0_i32_1 = arith.constant 0 : i32
    return %c0_i32, %c0_i32_0 : i32, i32
  }
  func.func @transform_2(%arg0: i32) -> (i32, i32) {
    %c0_i32 = arith.constant 0 : i32
    %c0_i32_0 = arith.constant 0 : i32
    %c0_i32_1 = arith.constant 0 : i32
    return %c0_i32, %c0_i32_0 : i32, i32
  }
  func.func @transform_3(%arg0: i32) -> (i32, i32) {
    %c0_i32 = arith.constant 0 : i32
    %c0_i32_0 = arith.constant 0 : i32
    %c0_i32_1 = arith.constant 0 : i32
    return %c0_i32, %c0_i32_0 : i32, i32
  }
  func.func @transform_4(%arg0: i32) -> (i32, i32, i32) {
    %c0_i32 = arith.constant 0 : i32
    %c0_i32_0 = arith.constant 0 : i32
    %c0_i32_1 = arith.constant 0 : i32
    return %arg0, %c0_i32, %c0_i32_0 : i32, i32, i32
  }
  func.func @transform_5(%arg0: i32) -> (i32, i32, i32) {
    %c0_i32 = arith.constant 0 : i32
    %c0_i32_0 = arith.constant 0 : i32
    %c0_i32_1 = arith.constant 0 : i32
    return %arg0, %c0_i32, %c0_i32_0 : i32, i32, i32
  }
  func.func @transform_6(%arg0: i32) -> (i32, i32, i32) {
    %c0_i32 = arith.constant 0 : i32
    %c0_i32_0 = arith.constant 0 : i32
    %c0_i32_1 = arith.constant 0 : i32
    return %arg0, %c0_i32, %c0_i32_0 : i32, i32, i32
  }
  func.func @transform_7(%arg0: i32) -> (i32, i32, i32) {
    %c0_i32 = arith.constant 0 : i32
    %c0_i32_0 = arith.constant 0 : i32
    %c0_i32_1 = arith.constant 0 : i32
    return %arg0, %c0_i32, %c0_i32_0 : i32, i32, i32
  }
  func.func @transform_8(%arg0: i32) -> (i32, i32, i32) {
    %c0_i32 = arith.constant 0 : i32
    %c0_i32_0 = arith.constant 0 : i32
    %c0_i32_1 = arith.constant 0 : i32
    return %arg0, %c0_i32, %c0_i32_0 : i32, i32, i32
  }
  func.func @transform_9(%arg0: i32) -> (i32, i32, i32) {
    %c0_i32 = arith.constant 0 : i32
    %c0_i32_0 = arith.constant 0 : i32
    %c0_i32_1 = arith.constant 0 : i32
    return %arg0, %c0_i32, %c0_i32_0 : i32, i32, i32
  }
  func.func @transform_10(%arg0: i32) -> (i32, i32, i32) {
    %c0_i32 = arith.constant 0 : i32
    %c0_i32_0 = arith.constant 0 : i32
    %c0_i32_1 = arith.constant 0 : i32
    return %arg0, %c0_i32, %c0_i32_0 : i32, i32, i32
  }
  func.func @transform_11(%arg0: i32) -> (i32, i32, i32) {
    %c0_i32 = arith.constant 0 : i32
    %c0_i32_0 = arith.constant 0 : i32
    %c0_i32_1 = arith.constant 0 : i32
    return %arg0, %c0_i32, %c0_i32_0 : i32, i32, i32
  }
  func.func @transform_12(%arg0: i32) -> (i32, i32, i32) {
    %c0_i32 = arith.constant 0 : i32
    %c0_i32_0 = arith.constant 0 : i32
    %c0_i32_1 = arith.constant 0 : i32
    return %arg0, %c0_i32, %c0_i32_0 : i32, i32, i32
  }
  func.func @transform_13(%arg0: i32) -> (i32, i32, i32) {
    %c0_i32 = arith.constant 0 : i32
    %c0_i32_0 = arith.constant 0 : i32
    %c0_i32_1 = arith.constant 0 : i32
    return %arg0, %c0_i32, %c0_i32_0 : i32, i32, i32
  }
  func.func @transform_14(%arg0: i32) -> (i32, i32, i32) {
    %c0_i32 = arith.constant 0 : i32
    %c0_i32_0 = arith.constant 0 : i32
    %c0_i32_1 = arith.constant 0 : i32
    return %arg0, %c0_i32, %c0_i32_0 : i32, i32, i32
  }
  func.func @transform_15(%arg0: i32) -> (i32, i32, i32) {
    %c0_i32 = arith.constant 0 : i32
    %c0_i32_0 = arith.constant 0 : i32
    %c0_i32_1 = arith.constant 0 : i32
    return %arg0, %c0_i32, %c0_i32_0 : i32, i32, i32
  }
  func.func @transform_16(%arg0: i32) -> (i32, i32) {
    %c0_i32 = arith.constant 0 : i32
    %c0_i32_0 = arith.constant 0 : i32
    %c0_i32_1 = arith.constant 0 : i32
    return %c0_i32, %c0_i32_0 : i32, i32
  }
  func.func @transform_17(%arg0: i32) -> (i32, i32) {
    %c0_i32 = arith.constant 0 : i32
    %c0_i32_0 = arith.constant 0 : i32
    %c0_i32_1 = arith.constant 0 : i32
    return %c0_i32, %c0_i32_0 : i32, i32
  }
  func.func @transform_18(%arg0: i32) -> (i32, i32) {
    %c0_i32 = arith.constant 0 : i32
    %c0_i32_0 = arith.constant 0 : i32
    %c0_i32_1 = arith.constant 0 : i32
    return %c0_i32, %c0_i32_0 : i32, i32
  }
  func.func @transform_19(%arg0: i32) -> (i32, i32) {
    %c0_i32 = arith.constant 0 : i32
    %c0_i32_0 = arith.constant 0 : i32
    %c0_i32_1 = arith.constant 0 : i32
    return %c0_i32, %c0_i32_0 : i32, i32
  }
  func.func @transform_20(%arg0: i32) -> (i32, i32) {
    %c0_i32 = arith.constant 0 : i32
    %c0_i32_0 = arith.constant 0 : i32
    %c0_i32_1 = arith.constant 0 : i32
    return %c0_i32, %c0_i32_0 : i32, i32
  }
}

</mosaic_0001>

<bundles_post_ra>
// kernel: bert_regressor_forward.1
= control target key start
LH: loop header
LB: loop body
LE: loop exit
PB: predicated region body
PF: predicated region fallthrough
CT: control target
= control target key end

     0   :  { %s3809_s0 = inlined_call_operand.vmem [shape: f32[16,32], index: 0, kind: input, shape index: {}]   ;;  %s3810_s1 = inlined_call_operand.vmem [shape: f32[2,8], index: 1, kind: input, shape index: {}]   ;;  %s3811_s2 = inlined_call_operand.vmem [shape: f32[1,32], index: 2, kind: input, shape index: {}]   ;;  %s3812_s3 = inlined_call_operand.vmem [shape: f32[1,32], index: 3, kind: input, shape index: {}]   ;;  %s3813_s4 = inlined_call_operand.vmem [shape: bf16[2,32,96], index: 4, kind: input, shape index: {}]   ;;  %s3814_s5 = inlined_call_operand.vmem [shape: f32[2,1,96], index: 5, kind: input, shape index: {}]   ;;  %s3815_s6 = inlined_call_operand.vmem [shape: bf16[2,32,32], index: 6, kind: input, shape index: {}]   ;;  %s3816_s7 = inlined_call_operand.vmem [shape: f32[2,1,32], index: 7, kind: input, shape index: {}]   ;;  %s3817_s8 = inlined_call_operand.vmem [shape: f32[2,1,32], index: 8, kind: input, shape index: {}]   ;;  %s3818_s9 = inlined_call_operand.vmem [shape: f32[2,1,32], index: 9, kind: input, shape index: {}]   ;;  %s3819_s10 = inlined_call_operand.vmem [shape: bf16[2,32,64], index: 10, kind: input, shape index: {}]   ;;  %s3820_s11 = inlined_call_operand.vmem [shape: f32[2,1,64], index: 11, kind: input, shape index: {}]   ;;  %s3821_s12 = inlined_call_operand.vmem [shape: bf16[2,64,32], index: 12, kind: input, shape index: {}]   ;;  %s3822_s13 = inlined_call_operand.vmem [shape: f32[2,1,32], index: 13, kind: input, shape index: {}]   ;;  %s3823_s14 = inlined_call_operand.vmem [shape: f32[2,1,32], index: 14, kind: input, shape index: {}]   ;;  %s3824_s15 = inlined_call_operand.vmem [shape: f32[2,1,32], index: 15, kind: input, shape index: {}]   ;;  %s3825_s16 = inlined_call_operand.vmem [shape: bf16[32,32], index: 16, kind: input, shape index: {}]   ;;  %s3826_s17 = inlined_call_operand.vmem [shape: f32[1,32], index: 17, kind: input, shape index: {}]   ;;  %s3827_s18 = inlined_call_operand.vmem [shape: f32[32,128], index: 18, kind: input, shape index: {}]   ;;  %s3828_s19 = inlined_call_operand.vmem [shape: f32[1,128], index: 19, kind: input, shape index: {}]   ;;  %s3829_s20 = inlined_call_operand.vmem [shape: f32[16,128], index: 20, kind: output, shape index: {}]  }
   0x1   :  { %3835 = sst [smem:[#allocation5_spill]] %s3809_s0 }
   0x2   :  { %3836 = sst [smem:[#allocation6_spill]] %s3810_s1  ;;  %s3434_s1 = smov 0  }
   0x3   :  { %3837 = sst [smem:[#allocation7_spill]] %s3811_s2 }
   0x4   :  { %3838 = sst [smem:[#allocation8_spill]] %s3812_s3 }
   0x5   :  { %3839 = sst [smem:[#allocation9_spill]] %s3813_s4 }
   0x6   :  { %3840 = sst [smem:[#allocation10_spill]] %s3815_s6 }
   0x7   :  { %3841 = sst [smem:[#allocation11_spill]] %s3825_s16 }
   0x8   :  { %3842 = sst [smem:[#allocation12_spill]] %s3826_s17 }
   0x9   :  { %3843 = sst [smem:[#allocation13_spill]] %s3827_s18 }
   0xa   :  { %3844 = sst [smem:[#allocation14_spill]] %s3828_s19 }
   0xb LB: > { %3845 = sst [smem:[#allocation3_spill]] %s3308_s1  ;;  %s3440_s22 = sadd.s32 4294967295, %s3308_s1   ;;  %s3308_s1 = sphi %s3434_s1, %s30_s1  }
   0xc   : > { %p2934_p0 = scmp.ge.s32.totalorder %s3308_s1, 1  ;;  %p651_p1 = scmp.lt.s32.totalorder %s3308_s1, 3 }
   0xe   : > { %p652_p2 = pnand %p2934_p0, %p651_p1 }
  0x10   : > { %655 = sbr.rel (%p652_p2) target bundleno = 3745 (0xea1), region = 100 }
  0x15   : > { %p743_p3 = scmp.lt.s32.totalorder %s3440_s22, 1  ;;  %s3846_s28 = sld [smem:[#allocation9_spill]] }
  0x16   : > { %s3847_s6 = sld [smem:[#allocation10_spill]]  ;;  %p2943_p4 = scmp.ne.s32.totalorder %s3440_s22, 0 }
  0x17   : > { %s3446_s23 = scalar_select %p743_p3, %s3440_s22, 1 }
  0x18   : > { %s3849_s1 = sld [smem:[#allocation5_spill]] (!%p2943_p4) }
  0x19   : > { %s3002_s24 = sshll.u32 %s3446_s23, 4  ;;  %s780_s2 = scalar_lea.vmem %s3822_s13, %s3446_s23 }
  0x1a   : > { %s783_s26 = scalar_lea.vmem %s3823_s14, %s3446_s23  ;;  %s786_s16 = scalar_lea.vmem %s3824_s15, %s3446_s23 }
  0x1b   : > { %s3456_s4 = scalar_lea.vmem %s3846_s28, %s3002_s24  ;;  %s3478_s28 = scalar_lea.vmem %s3819_s10, %s3002_s24 }
  0x1c   : > { %s3461_s0 = scalar_lea.vmem %s3847_s6, %s3002_s24  ;;  %791 = sbr.rel (%p2943_p4) target bundleno = 347 (0x15b), region = 104 }
  0x1d   : > { %3848 = sst [smem:[#allocation4_spill]] %s3461_s0  ;;  %s3005_s0 = sshll.u32 %s3446_s23, 5 }
  0x1e   : > { %s3488_s19 = scalar_lea.vmem %s3821_s12, %s3005_s0  ;;  %s3850_s21 = smov (!%p2943_p4), %s3849_s1 }
  0x1f   : > { %s3851_s27 = sld [smem:[#allocation7_spill]] (!%p2943_p4) }
  0x21   : > { %v792_v0 = vld [vmem:[%s3849_s1] sm:$0xff]  ;;  %vm796_vm0 = vcmask 261120   ;;  %v793_v1 = vld [vmem:[%s3850_s21 + $0x8] sm:$0xff]  ;;  %v3310_v14 = vmov 0.0   ;;  %s3852_s1 = sld [smem:[#allocation8_spill]] }
  0x22   : > { %v797_v2 = vsel %vm796_vm0, %v792_v0, 0.0  ;;  %v800_v3 = vsel %vm796_vm0, %v793_v1, 0.0  ;;  %842 = vst [vmem:[%s3829_s20] sm:$0xff] %v3310_v14  ;;  %843 = vst [vmem:[%s3829_s20 + $0x8] sm:$0xff] %v3310_v14 }
  0x23   : > { %798 = vadd.xlane.f32.xlu0 %v797_v2 }
  0x25   : > { %v2944_v22 = vld [vmem:[%s3851_s27] ss:$0 sm:$0xff] }
  0x27   : > { %801 = vadd.xlane.f32.xlu0 %v800_v3  ;;  %v2945_v24 = vld [vmem:[%s3852_s1] ss:$0 sm:$0xff] }
  0xac   : > { %v799_v4 = vpop.xlane.xlu0 %798 }
  0xad   : > { %v804_v5 = vmul.f32 0.03125, %v799_v4 }
  0xaf   : > { %v806_v6 = vsub.f32 %v792_v0, %v804_v5 }
  0xb0   : > { %v802_v7 = vpop.xlane.xlu0 %801 }
  0xb1   : > { %v805_v8 = vmul.f32 0.03125, %v802_v7  ;;  %v808_v9 = vmul.f32 %v806_v6, %v806_v6 }
  0xb3   : > { %v807_v10 = vsub.f32 %v793_v1, %v805_v8  ;;  %v810_v11 = vsel %vm796_vm0, %v808_v9, 0.0 }
  0xb4   : > { %811 = vadd.xlane.f32.xlu1 %v810_v11 }
  0xb5   : > { %v809_v12 = vmul.f32 %v807_v10, %v807_v10 }
  0xb7   : > { %v813_v13 = vsel %vm796_vm0, %v809_v12, 0.0 }
  0xb8   : > { %814 = vadd.xlane.f32.xlu1 %v813_v13 }
 0x13d   : > { %v812_v15 = vpop.xlane.xlu1 %811 }
 0x13e   : > { %v816_v16 = vmul.f32 0.03125, %v812_v15 }
 0x140   : > { %v818_v17 = vadd.f32 1e-12, %v816_v16 }
 0x141   : > { %v815_v18 = vpop.xlane.xlu1 %814 }
 0x142   : > { %3223 = vrsqrt.f32 %v818_v17  ;;  %v817_v19 = vmul.f32 0.03125, %v815_v18 }
 0x144   : > { %v819_v20 = vadd.f32 1e-12, %v817_v19 }
 0x146   : > { %3225 = vrsqrt.f32 %v819_v20 }
 0x14f   : > { %v3224_v21 = vpop.eup %3223 }
 0x150   : > { %v822_v23 = vmul.f32 %v3224_v21, %v806_v6 }
 0x152   : > { %v830_v25 = vmul.f32 %v2944_v22, %v822_v23 }
 0x153   : > { %v3226_v26 = vpop.eup %3225 }
 0x154   : > { %v838_v27 = vadd.f32 %v2945_v24, %v830_v25  ;;  %v823_v28 = vmul.f32 %v3226_v26, %v807_v10 }
 0x156   : > { %840 = vst.msk [vmem:[#allocation2] sm:$0xff] %vm796_vm0, %v838_v27  ;;  %v831_v29 = vmul.f32 %v2944_v22, %v823_v28 }
 0x158   : > { %v839_v30 = vadd.f32 %v2945_v24, %v831_v29 }
 0x15a   : > { %841 = vst.msk [vmem:[#allocation2 + $0x8] sm:$0xff] %vm796_vm0, %v839_v30 }
 0x15b PF: > { %v3242_v31 = vld [vmem:[%s3456_s4 + $0x8] sm:$0xff]   ;;  %v3311_v32 = vmov 0.0   ;;  %v3243_v33 = vld [vmem:[%s3456_s4] sm:$0xff]   ;;  %vm3312_vm1 = vmmov 0   ;;  %vm870_vm2 = vcmask 261120   ;;  %s3853_s6 = scalar_lea.vmem %s3814_s5, %s3446_s23  ;;  %s3313_s3 = smov 64   ;;  %v997_v46 = vlaneseq }
 0x15c   : > { %3061 = vmatprep.subr.bf16.mxu0 %v3311_v32  ;;  %3074 = vmatprep.subr.mxu1 %v3311_v32  ;;  %v2946_v37 = vld [vmem:[%s3853_s6] ss:$0 sm:$0xff]  ;;  %s3314_s17 = smov 96   ;;  %s3315_s18 = smov 88   ;;  %vm921_vm3 = vcmask 64512   ;;  %vm1603_vm4 = vcmask 130048  }
 0x15d   : > { %3062 = vmatpush3.bf16.msra.mxu0 %v3242_v31  ;;  %3065 = vmatprep.mubr.msk.bf16.mxu0 %vm3312_vm1, %v3311_v32  ;;  %v3533_v34 = vld [vmem:[#allocation2] sm:$0xff]  ;;  %s3316_s25 = smov 120   ;;  %s3317_s24 = smov 80   ;;  %v3576_v49 = vshrl.u32 %v997_v46, 7  ;;  %vm1605_vm5 = vcmask 195584   ;;  %vm2534_vm6 = vcmask 523264  }
 0x15e   : > { %3063 = vmatprep.subr.bf16.mxu0 %v3311_v32  ;;  %3076 = vmatprep.mubr.msk.f32.mxu1 %vm3312_vm1, %v3311_v32  ;;  %s3318_s27 = smov 112   ;;  %s3854_s1 = sld [smem:[#allocation6_spill]] }
 0x15f   : > { %v999_v51 = vsub.s32 0, %v3576_v49  ;;  %s3319_s4 = smov 72   ;;  %s3320_s0 = smov 104   ;;  %v1687_v26 = vsub.s32 1, %v3576_v49 }
 0x160   : > { %s3321_s6 = smov 48   ;;  %p2992_p5 = scmp.ne.s32.totalorder %s3440_s22, 1 }
 0x161   : > { %v3535_v35 = vld [vmem:[#allocation2 + $0x8] sm:$0xff]  ;;  %3064 = vmatpush3.bf16.msra.mxu0 %v3243_v33  ;;  %s3862_s29 = sld [smem:[#allocation12_spill]] (!%p2992_p5) }
 0x162   : > { %v850_v36 = vpack.c.bf16 %v3535_v35, %v3533_v34  ;;  %3069 = vmatprep.subr.mxu0 %v3311_v32 }
 0x164   : > { %3066 = vmatmul.mubr.msk.bf16.vlgmr.msra.gmra.mxu0 %vm870_vm2, %v850_v36  ;;  %v915_v47 = vld [vmem:[%s3854_s1] sm:$0x3]  ;;  %s3856_s1 = scalar_lea.vmem %s3816_s7, %s3446_s23 }
 0x165   : > { %3071 = vmatprep.mubr.msk.f32.mxu0 %vm3312_vm1, %v3311_v32  ;;  %v916_v48 = vsub.f32 1.0, %v915_v47 }
 0x167   : > { %v3578_v50 = vmul.f32 -10000.0, %v916_v48 }
 0x169   : > { %v3582_v52 = vrot.slane %v3578_v50, %v999_v51  ;;  %v1688_v33 = vrot.slane %v3578_v50, %v1687_v26 }
 0x224   : > { %v908_v38 = vpop.f32.mrf.mxu0 }
 0x225   : > { %v3551_v39 = vadd.f32 %v2946_v37, %v908_v38 }
 0x226   : > { %v3067_v40 = vpop.f32.mrf.mxu0 }
 0x227   : > { %1013 = vrot.lane.b32.xlu1 %v3551_v39, %s3313_s3  ;;  %919 = vrot.lane.b32.xlu0 %v3551_v39, %s3314_s17 }
 0x228   : > { %v911_v41 = vpop.f32.mrf.mxu0 }
 0x229   : > { %v3557_v42 = vadd.f32 %v2946_v37, %v911_v41 }
 0x22a   : > { %v3068_v43 = vpop.f32.mrf.mxu0 }
 0x22b   : > { %1091 = vrot.lane.b32.xlu1 %v3551_v39, %s3315_s18 }
 0x22f   : > { %1089 = vrot.lane.b32.xlu1 %v3551_v39, %s3316_s25 }
 0x233   : > { %1258 = vrot.lane.b32.xlu1 %v3551_v39, %s3317_s24 }
 0x237   : > { %1256 = vrot.lane.b32.xlu1 %v3551_v39, %s3318_s27 }
 0x299   : > { %v1014_v44 = vpop.permute.xlu1 %1013  ;;  %v920_v45 = vpop.permute.xlu0 %919 }
 0x29a   : > { %3070 = vmatpush3.xpose.msk.msra.mxu0 %vm921_vm3, %v920_v45  ;;  %3075 = vmatpush3.msra.mxu1 %v1014_v44 }
 0x29b   : > { %3079 = vmatprep.subr.mxu1 %v3311_v32  ;;  %3084 = vmatprep.subr.mxu0 %v3311_v32 }
 0x29d   : > { %3072 = vmatmul.mubr.msk.f32.vlgmr.msra.gmra.mxu0 %vm921_vm3, %v3551_v39  ;;  %v1092_v63 = vpop.permute.xlu1 %1091 }
 0x29e   : > { %3086 = vmatprep.mubr.msk.f32.mxu0 %vm3312_vm1, %v3311_v32 }
 0x2a1   : > { %v1090_v0 = vpop.permute.xlu1 %1089 }
 0x2a5   : > { %v1259_v1 = vpop.permute.xlu1 %1258 }
 0x2a9   : > { %v1257_v2 = vpop.permute.xlu1 %1256 }
 0x35d   : > { %v992_v53 = vpop.f32.mrf.mxu0 }
 0x35e   : > { %v996_v54 = vmul.f32 0.35355338, %v992_v53 }
 0x35f   : > { %v3073_v55 = vpop.f32.mrf.mxu0 }
 0x360   : > { %v1001_v56 = vadd.f32 %v3582_v52, %v996_v54 }
 0x362   : > { %v1002_v57 = vsel %vm921_vm3, %v1001_v56, -inf }
 0x363   : > { %1003 = vmax.xlane.f32.xlu0 %v1002_v57 }
 0x379   : > { %1425 = vrot.lane.b32.xlu0 %v3551_v39, %s3319_s4 }
 0x37d   : > { %1944 = vrot.lane.b32.xlu0 %v3557_v42, %s3318_s27  ;;  %s3326_s27 = smov 24  }
 0x381   : > { %2111 = vrot.lane.b32.xlu0 %v3557_v42, %s3320_s0 }
 0x3ec   : > { %v1004_v58 = vpop.xlane.xlu0 %1003 }
 0x3ed   : > { %v1005_v59 = vsub.f32 %v1001_v56, %v1004_v58 }
 0x3ef   : > { %v1006_v60 = vmul.f32 1.442695, %v1005_v59 }
 0x3f0   : > { %v1426_v9 = vpop.permute.xlu0 %1425 }
 0x3f1   : > { %3252 = vpow2.f32 %v1006_v60 }
 0x3f4   : > { %v1945_v12 = vpop.permute.xlu0 %1944 }
 0x3f8   : > { %v2112_v14 = vpop.permute.xlu0 %2111 }
 0x3fe   : > { %v3253_v61 = vpop.eup %3252 }
 0x3ff   : > { %v1008_v62 = vsel %vm921_vm3, %v3253_v61, 0.0 }
 0x400   : > { %1009 = vadd.xlane.f32.xlu1 %v1008_v62 }
 0x411   : > { %1423 = vrot.lane.b32.xlu1 %v3551_v39, %s3320_s0  ;;  %s3860_s0 = sld [smem:[#allocation11_spill]] (!%p2992_p5) }
 0x415   : > { %1608 = vrot.lane.b32.xlu1 %v3557_v42, %s3314_s17  ;;  %s3322_s17 = smov 40  }
 0x419   : > { %1779 = vrot.lane.b32.xlu1 %v3557_v42, %s3315_s18  ;;  %s3323_s18 = smov 56  }
 0x41d   : > { %1777 = vrot.lane.b32.xlu1 %v3557_v42, %s3316_s25  ;;  %s3324_s25 = smov 8  }
 0x421   : > { %1946 = vrot.lane.b32.xlu1 %v3557_v42, %s3317_s24  ;;  %s3325_s24 = smov 16  }
 0x425   : > { %2113 = vrot.lane.b32.xlu1 %v3557_v42, %s3319_s4 }
 0x489   : > { %v1010_v3 = vpop.xlane.xlu1 %1009 }
 0x48a   : > { %3254 = vrcp.f32 %v1010_v3 }
 0x48d   : > { %v1424_v4 = vpop.permute.xlu1 %1423 }
 0x491   : > { %v1609_v7 = vpop.permute.xlu1 %1608 }
 0x495   : > { %v1780_v8 = vpop.permute.xlu1 %1779 }
 0x497   : > { %v3255_v5 = vpop.eup %3254 }
 0x498   : > { %v1012_v6 = vmul.f32 %v3255_v5, %v3253_v61 }
 0x499   : > { %v1778_v10 = vpop.permute.xlu1 %1777 }
 0x49a   : > { %3077 = vmatmul.mubr.msk.f32.vlgmr.msra.gmra.mxu1 %vm921_vm3, %v1012_v6 }
 0x49b   : > { %3080 = vmatpush3.xpose.msk.msra.mxu1 %vm921_vm3, %v1092_v63  ;;  %3081 = vmatprep.mubr.msk.f32.mxu1 %vm3312_vm1, %v3311_v32 }
 0x49c   : > { %3089 = vmatprep.subr.mxu1 %v3311_v32 }
 0x49d   : > { %v1947_v11 = vpop.permute.xlu1 %1946 }
 0x49e   : > { %3082 = vmatmul.mubr.msk.f32.vlgmr.msra.gmra.mxu1 %vm921_vm3, %v1090_v0 }
 0x49f   : > { %3090 = vmatpush3.xpose.msk.msra.mxu1 %vm921_vm3, %v1259_v1  ;;  %3091 = vmatprep.mubr.msk.f32.mxu1 %vm3312_vm1, %v3311_v32 }
 0x4a0   : > { %3099 = vmatprep.subr.mxu1 %v3311_v32 }
 0x4a1   : > { %v2114_v13 = vpop.permute.xlu1 %2113 }
 0x4a2   : > { %3092 = vmatmul.mubr.msk.f32.vlgmr.msra.gmra.mxu1 %vm921_vm3, %v1257_v2 }
 0x4a3   : > { %3100 = vmatpush3.xpose.msk.msra.mxu1 %vm921_vm3, %v1426_v9  ;;  %3101 = vmatprep.mubr.msk.f32.mxu1 %vm3312_vm1, %v3311_v32 }
 0x4a4   : > { %3109 = vmatprep.subr.mxu1 %v3311_v32 }
 0x4a6   : > { %3102 = vmatmul.mubr.msk.f32.vlgmr.msra.gmra.mxu1 %vm921_vm3, %v1424_v4 }
 0x4a7   : > { %3110 = vmatpush3.xpose.msk.msra.mxu1 %vm921_vm3, %v1609_v7  ;;  %3111 = vmatprep.mubr.msk.f32.mxu1 %vm3312_vm1, %v3311_v32 }
 0x4a8   : > { %3119 = vmatprep.subr.mxu1 %v3311_v32 }
 0x4aa   : > { %3112 = vmatmul.mubr.msk.f32.vlgmr.msra.gmra.mxu1 %vm921_vm3, %v3557_v42 }
 0x4ab   : > { %3120 = vmatpush3.xpose.msk.msra.mxu1 %vm921_vm3, %v1780_v8  ;;  %3121 = vmatprep.mubr.msk.f32.mxu1 %vm3312_vm1, %v3311_v32 }
 0x4ac   : > { %3129 = vmatprep.subr.mxu1 %v3311_v32 }
 0x4ae   : > { %3122 = vmatmul.mubr.msk.f32.vlgmr.msra.gmra.mxu1 %vm921_vm3, %v1778_v10 }
 0x4af   : > { %3130 = vmatpush3.xpose.msk.msra.mxu1 %vm921_vm3, %v1947_v11  ;;  %3131 = vmatprep.mubr.msk.f32.mxu1 %vm3312_vm1, %v3311_v32 }
 0x4b0   : > { %3139 = vmatprep.subr.mxu1 %v3311_v32 }
 0x4b2   : > { %3132 = vmatmul.mubr.msk.f32.vlgmr.msra.gmra.mxu1 %vm921_vm3, %v1945_v12 }
 0x4b3   : > { %3140 = vmatpush3.xpose.msk.msra.mxu1 %vm921_vm3, %v2114_v13  ;;  %3141 = vmatprep.mubr.msk.f32.mxu1 %vm3312_vm1, %v3311_v32 }
 0x4b4   : > { %3149 = vmatprep.subr.bf16.mxu1 %v3311_v32 }
 0x4b6   : > { %3142 = vmatmul.mubr.msk.f32.vlgmr.msra.gmra.mxu1 %vm921_vm3, %v2112_v14 }
 0x4b7   : > { %3153 = vmatprep.mubr.msk.bf16.mxu1 %vm3312_vm1, %v3311_v32 }
 0x55a   : > { %v3639_v15 = vpop.f32.mrf.mxu1 }
 0x55c   : > { %v3078_v16 = vpop.f32.mrf.mxu1 }
 0x55e   : > { %v1163_v17 = vpop.f32.mrf.mxu1 }
 0x55f   : > { %v1167_v18 = vmul.f32 0.35355338, %v1163_v17 }
 0x560   : > { %v3083_v19 = vpop.f32.mrf.mxu1 }
 0x561   : > { %v1168_v20 = vadd.f32 %v1167_v18, %v3582_v52 }
 0x562   : > { %v1330_v21 = vpop.f32.mrf.mxu1 }
 0x563   : > { %v1334_v22 = vmul.f32 0.35355338, %v1330_v21  ;;  %v1169_v23 = vsel %vm921_vm3, %v1168_v20, -inf }
 0x564   : > { %1170 = vmax.xlane.f32.xlu1 %v1169_v23  ;;  %v3093_v24 = vpop.f32.mrf.mxu1 }
 0x565   : > { %v1335_v25 = vadd.f32 %v1334_v22, %v3582_v52 }
 0x566   : > { %v1497_v27 = vpop.f32.mrf.mxu1 }
 0x567   : > { %v1501_v28 = vmul.f32 0.35355338, %v1497_v27  ;;  %v1336_v29 = vsel %vm921_vm3, %v1335_v25, -inf }
 0x568   : > { %1337 = vmax.xlane.f32.xlu0 %v1336_v29  ;;  %v3103_v30 = vpop.f32.mrf.mxu1 }
 0x569   : > { %v1502_v31 = vadd.f32 %v1501_v28, %v3582_v52 }
 0x56a   : > { %v1680_v36 = vpop.f32.mrf.mxu1 }
 0x56b   : > { %v1684_v37 = vmul.f32 0.35355338, %v1680_v36  ;;  %v1503_v38 = vsel %vm921_vm3, %v1502_v31, -inf }
 0x56c   : > { %1504 = vmax.xlane.f32.xlu0 %v1503_v38  ;;  %v3113_v40 = vpop.f32.mrf.mxu1 }
 0x56d   : > { %v1689_v41 = vadd.f32 %v1688_v33, %v1684_v37 }
 0x56e   : > { %v1851_v43 = vpop.f32.mrf.mxu1 }
 0x56f   : > { %v1855_v44 = vmul.f32 0.35355338, %v1851_v43  ;;  %v1690_v45 = vsel %vm921_vm3, %v1689_v41, -inf }
 0x570   : > { %1691 = vmax.xlane.f32.xlu1 %v1690_v45  ;;  %v3123_v46 = vpop.f32.mrf.mxu1 }
 0x571   : > { %v1856_v47 = vadd.f32 %v1855_v44, %v1688_v33 }
 0x572   : > { %v2018_v48 = vpop.f32.mrf.mxu1 }
 0x573   : > { %v2022_v49 = vmul.f32 0.35355338, %v2018_v48  ;;  %v1857_v51 = vsel %vm921_vm3, %v1856_v47, -inf }
 0x574   : > { %1858 = vmax.xlane.f32.xlu0 %v1857_v51  ;;  %v3133_v50 = vpop.f32.mrf.mxu1 }
 0x575   : > { %v2023_v52 = vadd.f32 %v2022_v49, %v1688_v33 }
 0x576   : > { %v2185_v53 = vpop.f32.mrf.mxu1 }
 0x577   : > { %v2189_v54 = vmul.f32 0.35355338, %v2185_v53  ;;  %v2024_v55 = vsel %vm921_vm3, %v2023_v52, -inf }
 0x578   : > { %2025 = vmax.xlane.f32.xlu1 %v2024_v55  ;;  %v3143_v56 = vpop.f32.mrf.mxu1 }
 0x579   : > { %v2190_v57 = vadd.f32 %v2189_v54, %v1688_v33 }
 0x57b   : > { %v2191_v58 = vsel %vm921_vm3, %v2190_v57, -inf }
 0x57c   : > { %2192 = vmax.xlane.f32.xlu0 %v2191_v58 }
 0x589   : > { %1347 = vrot.lane.b32.xlu1 %v3551_v39, %s3321_s6 }
 0x58d   : > { %1514 = vrot.lane.b32.xlu1 %v3551_v39, %s3322_s17 }
 0x592   : > { %1180 = vrot.lane.b32.xlu0 %v3551_v39, %s3323_s18 }
 0x5ed   : > { %v1171_v59 = vpop.xlane.xlu1 %1170 }
 0x5ee   : > { %v1172_v60 = vsub.f32 %v1168_v20, %v1171_v59 }
 0x5f0   : > { %v1173_v61 = vmul.f32 1.442695, %v1172_v60 }
 0x5f1   : > { %v1338_v62 = vpop.xlane.xlu0 %1337 }
 0x5f2   : > { %3256 = vpow2.f32 %v1173_v61  ;;  %v1339_v63 = vsub.f32 %v1335_v25, %v1338_v62 }
 0x5f4   : > { %v1340_v0 = vmul.f32 1.442695, %v1339_v63 }
 0x5f5   : > { %v1505_v1 = vpop.xlane.xlu0 %1504 }
 0x5f6   : > { %3258 = vpow2.f32 %v1340_v0  ;;  %v1506_v8 = vsub.f32 %v1502_v31, %v1505_v1 }
 0x5f8   : > { %v1507_v11 = vmul.f32 1.442695, %v1506_v8 }
 0x5f9   : > { %v1692_v9 = vpop.xlane.xlu1 %1691 }
 0x5fa   : > { %v1693_v10 = vsub.f32 %v1689_v41, %v1692_v9  ;;  %3260 = vpow2.f32 %v1507_v11 }
 0x5fc   : > { %v1694_v14 = vmul.f32 1.442695, %v1693_v10 }
 0x5fd   : > { %v1859_v4 = vpop.xlane.xlu0 %1858 }
 0x5fe   : > { %v1860_v12 = vsub.f32 %v1856_v47, %v1859_v4  ;;  %3262 = vpow2.f32 %v1694_v14 }
 0x5ff   : > { %v3257_v2 = vpop.eup %3256 }
 0x600   : > { %v1175_v3 = vsel %vm921_vm3, %v3257_v2, 0.0  ;;  %v1861_v17 = vmul.f32 1.442695, %v1860_v12 }
 0x601   : > { %1176 = vadd.xlane.f32.xlu1 %v1175_v3  ;;  %v2026_v13 = vpop.xlane.xlu1 %2025 }
 0x602   : > { %v2027_v16 = vsub.f32 %v2023_v52, %v2026_v13  ;;  %3264 = vpow2.f32 %v1861_v17 }
 0x603   : > { %v3259_v5 = vpop.eup %3258 }
 0x604   : > { %v1342_v6 = vsel %vm921_vm3, %v3259_v5, 0.0  ;;  %v2028_v19 = vmul.f32 1.442695, %v2027_v16 }
 0x605   : > { %1343 = vadd.xlane.f32.xlu0 %v1342_v6  ;;  %v2193_v7 = vpop.xlane.xlu0 %2192  ;;  %v1348_v31 = vpop.permute.xlu1 %1347 }
 0x606   : > { %v2194_v18 = vsub.f32 %v2190_v57, %v2193_v7  ;;  %3266 = vpow2.f32 %v2028_v19 }
 0x607   : > { %v3261_v21 = vpop.eup %3260 }
 0x608   : > { %v2195_v20 = vmul.f32 1.442695, %v2194_v18  ;;  %v1509_v23 = vsel %vm921_vm3, %v3261_v21, 0.0 }
 0x609   : > { %v1181_v39 = vpop.permute.xlu0 %1180  ;;  %v1515_v33 = vpop.permute.xlu1 %1514 }
 0x60a   : > { %3085 = vmatpush3.msra.mxu0 %v1181_v39  ;;  %3268 = vpow2.f32 %v2195_v20 }
 0x60b   : > { %3094 = vmatprep.subr.mxu0 %v3311_v32  ;;  %v3263_v22 = vpop.eup %3262 }
 0x60c   : > { %v1696_v26 = vsel %vm921_vm3, %v3263_v22, 0.0 }
 0x60f   : > { %v3265_v24 = vpop.eup %3264 }
 0x610   : > { %v1863_v27 = vsel %vm921_vm3, %v3265_v24, 0.0 }
 0x612   : > { %1868 = vrot.lane.b32.xlu1 %v3557_v42, %s3323_s18  ;;  %s3858_s18 = scalar_lea.vmem %s3818_s9, %s3446_s23 }
 0x613   : > { %v3267_v25 = vpop.eup %3266 }
 0x614   : > { %v2030_v29 = vsel %vm921_vm3, %v3267_v25, 0.0 }
 0x617   : > { %v3667_v28 = vpop.eup %3268 }
 0x618   : > { %v2197_v30 = vsel %vm921_vm3, %v3667_v28, 0.0 }
 0x61b   : > { %1701 = vrot.lane.b32.xlu0 %v3557_v42, %s3313_s3  ;;  %s3855_s3 = sld [smem:[#allocation4_spill]] }
 0x621   : > { %v3244_v4 = vld [vmem:[%s3855_s3 + $0x8] sm:$0xff]   ;;  %v3245_v7 = vld [vmem:[%s3855_s3] sm:$0xff]  }
 0x622   : > { %3150 = vmatpush3.bf16.msra.mxu1 %v3244_v4 }
 0x623   : > { %3151 = vmatprep.subr.bf16.mxu1 %v3311_v32 }
 0x626   : > { %3152 = vmatpush3.bf16.msra.mxu1 %v3245_v7 }
 0x627   : > { %3165 = vmatprep.subr.bf16.mxu1 %v3311_v32 }
 0x636   : > { %1510 = vadd.xlane.f32.xlu1 %v1509_v23 }
 0x63a   : > { %1697 = vadd.xlane.f32.xlu0 %v1696_v26  ;;  %1864 = vadd.xlane.f32.xlu1 %v1863_v27 }
 0x63e   : > { %2031 = vadd.xlane.f32.xlu0 %v2030_v29  ;;  %2198 = vadd.xlane.f32.xlu1 %v2197_v30 }
 0x64f   : > { %2202 = vrot.lane.b32.xlu1 %v3557_v42, %s3322_s17 }
 0x654   : > { %2035 = vrot.lane.b32.xlu0 %v3557_v42, %s3321_s6  ;;  %s3861_s6 = sld [smem:[#allocation13_spill]] (!%p2992_p5) }
 0x68a   : > { %v1177_v36 = vpop.xlane.xlu1 %1176 }
 0x68b   : > { %3270 = vrcp.f32 %v1177_v36  ;;  %v2974_v36 = vld [vmem:[%s3856_s1] ss:$0 sm:$0xff] }
 0x68e   : > { %v1344_v37 = vpop.xlane.xlu0 %1343  ;;  %v1869_v42 = vpop.permute.xlu1 %1868 }
 0x68f   : > { %3272 = vrcp.f32 %v1344_v37 }
 0x692   : > { %v1702_v44 = vpop.permute.xlu0 %1701 }
 0x698   : > { %v3271_v38 = vpop.eup %3270 }
 0x699   : > { %v1179_v40 = vmul.f32 %v3271_v38, %v3257_v2 }
 0x69b   : > { %3087 = vmatmul.mubr.msk.f32.vlgmr.msra.gmra.mxu0 %vm921_vm3, %v1179_v40 }
 0x69c   : > { %v3273_v41 = vpop.eup %3272  ;;  %3095 = vmatpush3.msra.mxu0 %v1348_v31  ;;  %3096 = vmatprep.mubr.msk.f32.mxu0 %vm3312_vm1, %v3311_v32 }
 0x69d   : > { %3104 = vmatprep.subr.mxu0 %v3311_v32  ;;  %v1346_v43 = vmul.f32 %v3273_v41, %v3259_v5 }
 0x69f   : > { %3097 = vmatmul.mubr.msk.f32.vlgmr.msra.gmra.mxu0 %vm921_vm3, %v1346_v43 }
 0x6a0   : > { %3105 = vmatpush3.msra.mxu0 %v1515_v33  ;;  %3106 = vmatprep.mubr.msk.f32.mxu0 %vm3312_vm1, %v3311_v32 }
 0x6a1   : > { %3114 = vmatprep.subr.mxu0 %v3311_v32 }
 0x6bf   : > { %v1511_v45 = vpop.xlane.xlu1 %1510 }
 0x6c0   : > { %3274 = vrcp.f32 %v1511_v45 }
 0x6c3   : > { %v1698_v46 = vpop.xlane.xlu0 %1697  ;;  %v1865_v47 = vpop.xlane.xlu1 %1864 }
 0x6c4   : > { %3276 = vrcp.f32 %v1698_v46 }
 0x6c5   : > { %3278 = vrcp.f32 %v1865_v47 }
 0x6c7   : > { %v2032_v48 = vpop.xlane.xlu0 %2031  ;;  %v2199_v49 = vpop.xlane.xlu1 %2198 }
 0x6c8   : > { %3280 = vrcp.f32 %v2032_v48 }
 0x6c9   : > { %3282 = vrcp.f32 %v2199_v49 }
 0x6cb   : > { %v2036_v57 = vpop.permute.xlu0 %2035  ;;  %v2203_v60 = vpop.permute.xlu1 %2202 }
 0x6cd   : > { %v3275_v51 = vpop.eup %3274 }
 0x6ce   : > { %v1513_v50 = vmul.f32 %v3275_v51, %v3261_v21 }
 0x6d0   : > { %3107 = vmatmul.mubr.msk.f32.vlgmr.msra.gmra.mxu0 %vm921_vm3, %v1513_v50 }
 0x6d1   : > { %3115 = vmatpush3.msra.mxu0 %v1702_v44  ;;  %3116 = vmatprep.mubr.msk.f32.mxu0 %vm3312_vm1, %v3311_v32  ;;  %v3277_v52 = vpop.eup %3276 }
 0x6d2   : > { %3124 = vmatprep.subr.mxu0 %v3311_v32  ;;  %v1700_v53 = vmul.f32 %v3277_v52, %v3263_v22  ;;  %v3279_v54 = vpop.eup %3278 }
 0x6d3   : > { %v1867_v55 = vmul.f32 %v3279_v54, %v3265_v24 }
 0x6d4   : > { %3117 = vmatmul.mubr.msk.f32.vlgmr.msra.gmra.mxu0 %vm921_vm3, %v1700_v53 }
 0x6d5   : > { %3125 = vmatpush3.msra.mxu0 %v1869_v42  ;;  %3126 = vmatprep.mubr.msk.f32.mxu0 %vm3312_vm1, %v3311_v32  ;;  %v3281_v56 = vpop.eup %3280 }
 0x6d6   : > { %3134 = vmatprep.subr.mxu0 %v3311_v32  ;;  %v2034_v58 = vmul.f32 %v3281_v56, %v3267_v25  ;;  %v3283_v59 = vpop.eup %3282  ;;  %v3247_v56 = vld [vmem:[%s3478_s28] sm:$0xff]  }
 0x6d7   : > { %v2201_v61 = vmul.f32 %v3283_v59, %v3667_v28 }
 0x6d8   : > { %3127 = vmatmul.mubr.msk.f32.vlgmr.msra.gmra.mxu0 %vm921_vm3, %v1867_v55 }
 0x6d9   : > { %3135 = vmatpush3.msra.mxu0 %v2036_v57  ;;  %3136 = vmatprep.mubr.msk.f32.mxu0 %vm3312_vm1, %v3311_v32 }
 0x6da   : > { %3144 = vmatprep.subr.mxu0 %v3311_v32 }
 0x6dc   : > { %3137 = vmatmul.mubr.msk.f32.vlgmr.msra.gmra.mxu0 %vm921_vm3, %v2034_v58 }
 0x6dd   : > { %3145 = vmatpush3.msra.mxu0 %v2203_v60  ;;  %3146 = vmatprep.mubr.msk.f32.mxu0 %vm3312_vm1, %v3311_v32 }
 0x6de   : > { %3157 = vmatprep.subr.bf16.mxu0 %v3311_v32 }
 0x6e0   : > { %3147 = vmatmul.mubr.msk.f32.vlgmr.msra.gmra.mxu0 %vm921_vm3, %v2201_v61 }
 0x6e1   : > { %3161 = vmatprep.mubr.msk.bf16.mxu0 %vm3312_vm1, %v3311_v32 }
 0x75b   : > { %v1252_v62 = vpop.f32.mrf.mxu0 }
 0x75d   : > { %v3088_v63 = vpop.f32.mrf.mxu0 }
 0x75f   : > { %v1419_v0 = vpop.f32.mrf.mxu0 }
 0x761   : > { %v3098_v1 = vpop.f32.mrf.mxu0 }
 0x790   : > { %v1586_v2 = vpop.f32.mrf.mxu0 }
 0x792   : > { %v3108_v3 = vpop.f32.mrf.mxu0 }
 0x794   : > { %v1773_v5 = vpop.f32.mrf.mxu0 }
 0x796   : > { %v3118_v6 = vpop.f32.mrf.mxu0 }
 0x798   : > { %v1940_v39 = vpop.f32.mrf.mxu0 }
 0x799   : > { %v3227_v8 = vpack.i.bf16 %v1940_v39, %v1252_v62 }
 0x79a   : > { %v3128_v9 = vpop.f32.mrf.mxu0 }
 0x79b   : > { %3228 = vrot.lane.b32.xlu0 %v3227_v8, %s3324_s25  ;;  %v3248_v9 = vld [vmem:[%s3488_s19 + $0x18] sm:$0xff]  }
 0x79c   : > { %v2107_v10 = vpop.f32.mrf.mxu0 }
 0x79d   : > { %v3232_v11 = vpack.i.bf16 %v2107_v10, %v1419_v0  ;;  %v3249_v10 = vld [vmem:[%s3488_s19 + $0x10] sm:$0xff]  }
 0x79e   : > { %v3138_v12 = vpop.f32.mrf.mxu0 }
 0x79f   : > { %3233 = vrot.lane.b32.xlu1 %v3232_v11, %s3325_s24  ;;  %v3250_v11 = vld [vmem:[%s3488_s19 + $0x8] sm:$0xff]   ;;  %v3251_v12 = vld [vmem:[%s3488_s19] sm:$0xff]   ;;  %s3859_s24 = scalar_lea.vmem %s3820_s11, %s3446_s23 }
 0x7a0   : > { %v2274_v13 = vpop.f32.mrf.mxu0 }
 0x7a1   : > { %v3237_v14 = vpack.i.bf16 %v2274_v13, %v1586_v2  ;;  %v2980_v13 = vld [vmem:[%s3859_s24] ss:$0 sm:$0xff] }
 0x7a2   : > { %v3148_v16 = vpop.f32.mrf.mxu0 }
 0x7a3   : > { %3238 = vrot.lane.b32.xlu0 %v3237_v14, %s3326_s27 }
 0x80d   : > { %v3229_v17 = vpop.permute.xlu0 %3228 }
 0x80e   : > { %v3231_v19 = vunpack.i.h.bf16 %v3229_v17  ;;  %v3230_v20 = vunpack.i.l.bf16 %v3229_v17 }
 0x810   : > { %v2290_v24 = vsel %vm921_vm3, %v1773_v5, %v3231_v19  ;;  %v1602_v25 = vsel %vm921_vm3, %v3639_v15, %v3230_v20  ;;  %v2979_v5 = vld [vmem:[%s3858_s18] ss:$0 sm:$0xff] }
 0x811   : > { %v3234_v18 = vpop.permute.xlu1 %3233 }
 0x812   : > { %v3236_v21 = vunpack.i.h.bf16 %v3234_v18  ;;  %v3235_v22 = vunpack.i.l.bf16 %v3234_v18 }
 0x814   : > { %v2291_v28 = vsel %vm1603_vm4, %v2290_v24, %v3236_v21  ;;  %v1604_v29 = vsel %vm1603_vm4, %v1602_v25, %v3235_v22 }
 0x815   : > { %v3239_v23 = vpop.permute.xlu0 %3238 }
 0x816   : > { %v3241_v26 = vunpack.i.h.bf16 %v3239_v23  ;;  %v3240_v27 = vunpack.i.l.bf16 %v3239_v23 }
 0x818   : > { %v2292_v30 = vsel %vm1605_vm5, %v2291_v28, %v3241_v26  ;;  %v1606_v31 = vsel %vm1605_vm5, %v1604_v29, %v3240_v27 }
 0x819   : > { %v2297_v33 = vpack.c.bf16 %v2292_v30, %v1606_v31 }
 0x81b   : > { %3154 = vmatmul.mubr.msk.bf16.vlgmr.msra.gmra.mxu1 %vm870_vm2, %v2297_v33 }
 0x81c   : > { %3173 = vmatprep.mubr.msk.bf16.mxu1 %vm3312_vm1, %v3311_v32  ;;  %3166 = vmatpush3.bf16.msra.mxu1 %v3248_v9 }
 0x81d   : > { %3167 = vmatprep.subr.bf16.mxu1 %v3311_v32 }
 0x820   : > { %3168 = vmatpush3.bf16.msra.mxu1 %v3249_v10 }
 0x821   : > { %3169 = vmatprep.subr.bf16.mxu1 %v3311_v32 }
 0x824   : > { %3170 = vmatpush3.bf16.msra.mxu1 %v3250_v11 }
 0x825   : > { %3171 = vmatprep.subr.bf16.mxu1 %v3311_v32 }
 0x828   : > { %3172 = vmatpush3.bf16.msra.mxu1 %v3251_v12 }
 0x8db   : > { %v2354_v37 = vpop.f32.mrf.mxu1 }
 0x8dc   : > { %v2355_v38 = vadd.f32 %v2974_v36, %v2354_v37 }
 0x8dd   : > { %v3155_v15 = vpop.f32.mrf.mxu1 }
 0x8de   : > { %v2361_v40 = vadd.f32 %v2355_v38, %v3533_v34 }
 0x8df   : > { %v2357_v41 = vpop.f32.mrf.mxu1 }
 0x8e0   : > { %v2358_v43 = vadd.f32 %v2974_v36, %v2357_v41  ;;  %v2365_v42 = vsel %vm870_vm2, %v2361_v40, 0.0 }
 0x8e1   : > { %2366 = vadd.xlane.f32.xlu1 %v2365_v42  ;;  %v3156_v44 = vpop.f32.mrf.mxu1 }
 0x8e2   : > { %v2362_v45 = vadd.f32 %v2358_v43, %v3535_v35  ;;  %v3246_v35 = vld [vmem:[%s3478_s28 + $0x8] sm:$0xff]   ;;  %s3857_s28 = scalar_lea.vmem %s3817_s8, %s3446_s23  ;;  %v2984_v43 = vld [vmem:[%s780_s2] ss:$0 sm:$0xff] }
 0x8e3   : > { %3158 = vmatpush3.bf16.msra.mxu0 %v3246_v35  ;;  %v2978_v1 = vld [vmem:[%s3857_s28] ss:$0 sm:$0xff] }
 0x8e4   : > { %v2368_v46 = vsel %vm870_vm2, %v2362_v45, 0.0  ;;  %3159 = vmatprep.subr.bf16.mxu0 %v3311_v32 }
 0x8e5   : > { %2369 = vadd.xlane.f32.xlu0 %v2368_v46 }
 0x8e7   : > { %3160 = vmatpush3.bf16.msra.mxu0 %v3247_v56 }
 0x96a   : > { %v2367_v47 = vpop.xlane.xlu1 %2366 }
 0x96b   : > { %v2372_v48 = vmul.f32 0.03125, %v2367_v47 }
 0x96d   : > { %v2374_v49 = vsub.f32 %v2361_v40, %v2372_v48 }
 0x96e   : > { %v2370_v51 = vpop.xlane.xlu0 %2369 }
 0x96f   : > { %v2373_v50 = vmul.f32 0.03125, %v2370_v51  ;;  %v2376_v52 = vmul.f32 %v2374_v49, %v2374_v49 }
 0x971   : > { %v2375_v34 = vsub.f32 %v2362_v45, %v2373_v50  ;;  %v2378_v53 = vsel %vm870_vm2, %v2376_v52, 0.0 }
 0x972   : > { %2379 = vadd.xlane.f32.xlu0 %v2378_v53 }
 0x973   : > { %v2377_v54 = vmul.f32 %v2375_v34, %v2375_v34 }
 0x975   : > { %v2381_v55 = vsel %vm870_vm2, %v2377_v54, 0.0 }
 0x976   : > { %2382 = vadd.xlane.f32.xlu1 %v2381_v55 }
 0x9fb   : > { %v2380_v57 = vpop.xlane.xlu0 %2379 }
 0x9fc   : > { %v2384_v58 = vmul.f32 0.03125, %v2380_v57 }
 0x9fe   : > { %v2386_v59 = vadd.f32 1e-12, %v2384_v58 }
 0x9ff   : > { %v2383_v60 = vpop.xlane.xlu1 %2382 }
 0xa00   : > { %3284 = vrsqrt.f32 %v2386_v59  ;;  %v2385_v61 = vmul.f32 0.03125, %v2383_v60 }
 0xa02   : > { %v2387_v62 = vadd.f32 1e-12, %v2385_v61 }
 0xa04   : > { %3286 = vrsqrt.f32 %v2387_v62 }
 0xa0d   : > { %v3285_v63 = vpop.eup %3284 }
 0xa0e   : > { %v2390_v0 = vmul.f32 %v3285_v63, %v2374_v49 }
 0xa10   : > { %v2398_v4 = vmul.f32 %v2978_v1, %v2390_v0 }
 0xa11   : > { %v3287_v2 = vpop.eup %3286 }
 0xa12   : > { %v2391_v3 = vmul.f32 %v3287_v2, %v2375_v34  ;;  %v2406_v7 = vadd.f32 %v2979_v5, %v2398_v4  ;;  %v2990_v4 = vld [vmem:[%s783_s26] ss:$0 sm:$0xff]  ;;  %s3863_s26 = sld [smem:[#allocation14_spill]] (!%p2992_p5) }
 0xa14   : > { %v2399_v6 = vmul.f32 %v2978_v1, %v2391_v3 }
 0xa16   : > { %v2407_v39 = vadd.f32 %v2979_v5, %v2399_v6  ;;  %v2991_v6 = vld [vmem:[%s786_s16] ss:$0 sm:$0xff] }
 0xa18   : > { %v2412_v8 = vpack.c.bf16 %v2407_v39, %v2406_v7 }
 0xa1a   : > { %3162 = vmatmul.mubr.msk.bf16.vlgmr.msra.gmra.mxu0 %vm870_vm2, %v2412_v8 }
 0xada   : > { %v2469_v14 = vpop.f32.mrf.mxu0 }
 0xadb   : > { %v2470_v16 = vadd.f32 %v2980_v13, %v2469_v14 }
 0xadc   : > { %v3163_v17 = vpop.f32.mrf.mxu0 }
 0xadd   : > { %v2478_v18 = vmul.f32 0.044715, %v2470_v16  ;;  %v2476_v36 = vmul.f32 0.5, %v2470_v16 }
 0xade   : > { %v2472_v19 = vpop.f32.mrf.mxu0 }
 0xadf   : > { %v2480_v20 = vmul.f32 %v2478_v18, %v2470_v16  ;;  %v2473_v21 = vadd.f32 %v2980_v13, %v2472_v19 }
 0xae0   : > { %v3164_v22 = vpop.f32.mrf.mxu0 }
 0xae1   : > { %v2482_v23 = vmul.f32 %v2480_v20, %v2470_v16  ;;  %v2479_v24 = vmul.f32 0.044715, %v2473_v21  ;;  %v2477_v37 = vmul.f32 0.5, %v2473_v21 }
 0xae3   : > { %v2484_v25 = vadd.f32 %v2482_v23, %v2470_v16  ;;  %v2481_v26 = vmul.f32 %v2479_v24, %v2473_v21 }
 0xae5   : > { %v2486_v27 = vmul.f32 0.7978846, %v2484_v25  ;;  %v2483_v32 = vmul.f32 %v2481_v26, %v2473_v21 }
 0xae7   : > { %3288 = vtanh.f32 %v2486_v27  ;;  %v2485_v28 = vadd.f32 %v2483_v32, %v2473_v21 }
 0xae9   : > { %v2487_v29 = vmul.f32 0.7978846, %v2485_v28 }
 0xaeb   : > { %3290 = vtanh.f32 %v2487_v29 }
 0xaf4   : > { %v3289_v30 = vpop.eup %3288 }
 0xaf5   : > { %v2490_v31 = vadd.f32 1.0, %v3289_v30 }
 0xaf7   : > { %v2492_v15 = vmul.f32 %v2490_v31, %v2476_v36 }
 0xaf8   : > { %v3291_v33 = vpop.eup %3290 }
 0xaf9   : > { %v2491_v38 = vadd.f32 1.0, %v3291_v33 }
 0xafb   : > { %v2493_v40 = vmul.f32 %v2491_v38, %v2477_v37 }
 0xafd   : > { %v2502_v41 = vpack.c.bf16 %v2493_v40, %v2492_v15 }
 0xaff   : > { %3174 = vmatmul.mubr.msk.bf16.vlgmr.msra.gmra.mxu1 %vm2534_vm6, %v2502_v41 }
 0xbbf   : > { %v2572_v42 = vpop.f32.mrf.mxu1 }
 0xbc0   : > { %v2573_v44 = vadd.f32 %v2984_v43, %v2572_v42 }
 0xbc1   : > { %v3175_v45 = vpop.f32.mrf.mxu1 }
 0xbc2   : > { %v2579_v46 = vadd.f32 %v2573_v44, %v2406_v7 }
 0xbc3   : > { %v2575_v47 = vpop.f32.mrf.mxu1 }
 0xbc4   : > { %v2576_v48 = vadd.f32 %v2984_v43, %v2575_v47  ;;  %v2583_v49 = vsel %vm870_vm2, %v2579_v46, 0.0 }
 0xbc5   : > { %2584 = vadd.xlane.f32.xlu0 %v2583_v49  ;;  %v3176_v51 = vpop.f32.mrf.mxu1 }
 0xbc6   : > { %v2580_v50 = vadd.f32 %v2576_v48, %v2407_v39 }
 0xbc8   : > { %v2586_v52 = vsel %vm870_vm2, %v2580_v50, 0.0 }
 0xbc9   : > { %2587 = vadd.xlane.f32.xlu1 %v2586_v52 }
 0xc4e   : > { %v2585_v34 = vpop.xlane.xlu0 %2584 }
 0xc4f   : > { %v2589_v53 = vmul.f32 0.03125, %v2585_v34 }
 0xc51   : > { %v2591_v54 = vsub.f32 %v2579_v46, %v2589_v53 }
 0xc52   : > { %v2588_v55 = vpop.xlane.xlu1 %2587 }
 0xc53   : > { %v2590_v35 = vmul.f32 0.03125, %v2588_v55  ;;  %v2593_v56 = vmul.f32 %v2591_v54, %v2591_v54 }
 0xc55   : > { %v2592_v57 = vsub.f32 %v2580_v50, %v2590_v35  ;;  %v2595_v58 = vsel %vm870_vm2, %v2593_v56, 0.0 }
 0xc56   : > { %2596 = vadd.xlane.f32.xlu0 %v2595_v58 }
 0xc57   : > { %v2594_v59 = vmul.f32 %v2592_v57, %v2592_v57 }
 0xc59   : > { %v2598_v60 = vsel %vm870_vm2, %v2594_v59, 0.0 }
 0xc5a   : > { %2599 = vadd.xlane.f32.xlu1 %v2598_v60 }
 0xcdf   : > { %v2597_v61 = vpop.xlane.xlu0 %2596 }
 0xce0   : > { %v2601_v62 = vmul.f32 0.03125, %v2597_v61 }
 0xce2   : > { %v2603_v63 = vadd.f32 1e-12, %v2601_v62 }
 0xce3   : > { %v2600_v0 = vpop.xlane.xlu1 %2599 }
 0xce4   : > { %3292 = vrsqrt.f32 %v2603_v63  ;;  %v2602_v1 = vmul.f32 0.03125, %v2600_v0 }
 0xce6   : > { %v2604_v2 = vadd.f32 1e-12, %v2602_v1 }
 0xce8   : > { %3294 = vrsqrt.f32 %v2604_v2 }
 0xcf1   : > { %v3293_v3 = vpop.eup %3292 }
 0xcf2   : > { %v2607_v5 = vmul.f32 %v3293_v3, %v2591_v54 }
 0xcf4   : > { %v2615_v7 = vmul.f32 %v2990_v4, %v2607_v5 }
 0xcf5   : > { %v3295_v39 = vpop.eup %3294 }
 0xcf6   : > { %v2623_v8 = vadd.f32 %v2991_v6, %v2615_v7  ;;  %v2608_v9 = vmul.f32 %v3295_v39, %v2592_v57 }
 0xcf8   : > { %2625 = vst.msk [vmem:[#allocation2] sm:$0xff] %vm870_vm2, %v2623_v8  ;;  %v2616_v10 = vmul.f32 %v2990_v4, %v2608_v9  ;;  %2630 = sbr.rel (%p2992_p5) target bundleno = 3745 (0xea1), region = 108 }
 0xcfa   : > { %v2624_v11 = vadd.f32 %v2991_v6, %v2616_v10 }
 0xcfc   : > { %2626 = vst.msk [vmem:[#allocation2 + $0x8] sm:$0xff] %vm870_vm2, %v2624_v11 }
 0xcfd   : > { %v3296_v12 = vld [vmem:[%s3860_s0 + $0x8] sm:$0xff]   ;;  %v3327_v13 = vmov 0.0   ;;  %v3297_v14 = vld [vmem:[%s3860_s0] sm:$0xff]   ;;  %vm3328_vm7 = vmmov 0   ;;  %v2635_v16 = vpack.c.bf16 %v2624_v11, %v2623_v8  ;;  %v2704_v17 = vld [vmem:[%s3861_s6 + $0x18] sm:$0xff] }
 0xcfe   : > { %3177 = vmatprep.subr.bf16.mxu0 %v3327_v13  ;;  %3181 = vmatprep.mubr.msk.bf16.mxu0 %vm3328_vm7, %v3327_v13  ;;  %v2703_v18 = vld [vmem:[%s3861_s6 + $0x10] sm:$0xff]  ;;  %v2702_v19 = vld [vmem:[%s3861_s6 + $0x8] sm:$0xff]  ;;  %v2701_v20 = vld [vmem:[%s3861_s6] sm:$0xff] }
 0xcff   : > { %3178 = vmatpush3.bf16.msra.mxu0 %v3296_v12  ;;  %3185 = vmatprep.subr.mxu1 %v2704_v17  ;;  %v2993_v21 = vld [vmem:[%s3862_s29] ss:$0 sm:$0xff] }
 0xd00   : > { %3179 = vmatprep.subr.bf16.mxu0 %v3327_v13  ;;  %3186 = vmatpush3.msra.mxu1 %v2704_v17  ;;  %v2997_v29 = vld [vmem:[%s3863_s26] ss:$0 sm:$0xff] }
 0xd01   : > { %3187 = vmatprep.subr.mxu1 %v2703_v18 }
 0xd02   : > { %3188 = vmatpush3.msra.mxu1 %v2703_v18 }
 0xd03   : > { %3180 = vmatpush3.bf16.msra.mxu0 %v3297_v14  ;;  %3189 = vmatprep.subr.mxu1 %v2702_v19 }
 0xd04   : > { %3190 = vmatpush3.msra.mxu1 %v2702_v19 }
 0xd05   : > { %3191 = vmatprep.subr.mxu1 %v2701_v20 }
 0xd06   : > { %3182 = vmatmul.mubr.msk.bf16.vlgmr.msra.gmra.mxu0 %vm870_vm2, %v2635_v16  ;;  %3192 = vmatpush3.msra.mxu1 %v2701_v20 }
 0xdc6   : > { %v2692_v22 = vpop.f32.mrf.mxu0 }
 0xdc7   : > { %v2693_v23 = vadd.f32 %v2993_v21, %v2692_v22 }
 0xdc8   : > { %v3183_v24 = vpop.f32.mrf.mxu0 }
 0xdc9   : > { %3298 = vtanh.f32 %v2693_v23 }
 0xdca   : > { %v2695_v25 = vpop.f32.mrf.mxu0 }
 0xdcb   : > { %v2696_v26 = vadd.f32 %v2993_v21, %v2695_v25 }
 0xdcc   : > { %v3184_v27 = vpop.f32.mrf.mxu0 }
 0xdcd   : > { %3300 = vtanh.f32 %v2696_v26 }
 0xdd6   : > { %v3299_v32 = vpop.eup %3298 }
 0xdd7   : > { %3193 = vmatprep.mubr.msk.f32.mxu1 %vm870_vm2, %v3299_v32 }
 0xdda   : > { %v3301_v28 = vpop.eup %3300 }
 0xddb   : > { %3194 = vmatmul.mubr.msk.f32.vlgmr.msra.gmra.mxu1 %vm870_vm2, %v3301_v28 }
 0xe9b   : > { %v3195_v30 = vpop.f32.mrf.mxu1 }
 0xe9c   : > { %v2790_v31 = vadd.f32 %v3195_v30, %v2997_v29 }
 0xe9d   : > { %v2784_v33 = vpop.f32.mrf.mxu1 }
 0xe9e   : > { %2794 = vst [vmem:[%s3829_s20 + $0x8] sm:$0xff] %v2790_v31  ;;  %v2785_v36 = vadd.f32 %v2997_v29, %v2784_v33 }
 0xea0   : > { %2793 = vst [vmem:[%s3829_s20] sm:$0xff] %v2785_v36 }
 0xea1 PF: > { %s3864_s28 = sld [smem:[#allocation3_spill]] }
 0xea7   : > { %s30_s1 = sadd.s32 1, %s3864_s28  }
 0xea8   : > { %p27_p6 = scmp.ge.s32.totalorder %s30_s1, 4  }
 0xeaa   :  { %29 = sbr.rel (!%p27_p6) target bundleno = 11 (0xb), region = 167 }

</bundles_post_ra>
